<compile_context>
chip_gen: v7x
topology: tpu7x:2x2x1
jax: 0.10.0
libtpu: 0.0.40
codegen_flags: <defaults>
</compile_context>

<pallas_src>
import jax
import jax.numpy as jnp
from jax import lax
from jax.experimental import pallas as pl
from jax.experimental.pallas import tpu as pltpu

SEQ, BATCH, INPUT, HIDDEN = 5, 3, 10, 20
NUM_LAYERS, NUM_DIRS, FC_OUT = 2, 2, 2
G4 = 4 * HIDDEN                      # 80: packed gate width
OUT_W = NUM_DIRS * FC_OUT            # 4:  [fc(fwd) | fc(bwd)]
SB = SEQ * BATCH                     # 15

GATE_ORDER = (0, 1, 3, 2)            # PyTorch (i, f, g, o) rows -> packed (i, f, o, g)

# ---- packed-parameter row layout (all block starts 8-row aligned) ------------
ROW_WIH0  = (0, 16)                  # (10, 80) per direction
ROW_WHH0  = (32, 56)                 # (20, 80)
ROW_WIH1A = (80, 128)                # (20, 80)  multiplies layer-0 fwd output
ROW_WIH1B = (104, 152)               # (20, 80)  multiplies layer-0 bwd output
ROW_WHH1  = (176, 200)               # (20, 80)
ROW_B0    = (224, 232)               # (1, 80)   b_ih + b_hh
ROW_B1    = (240, 248)               # (1, 80)
ROW_WFC   = (256, 280)               # (20, 4)   [W^T|0] (fwd) / [0|W^T] (bwd)
ROW_BFC   = 304                      # (1, 4)    [b | b]
P_ROWS    = 312


# ------------------------------ Pallas kernel ---------------------------------

def _sigmoid(x):
    # Exact sigmoid via tanh: single EUP transcendental, no divide.
    return 0.5 * jnp.tanh(0.5 * x) + 0.5


def _lstm_cell(z, h, c, whh):
    """One LSTM step. z = x @ W_ih + (b_ih + b_hh), gates packed (i, f, o, g)."""
    gates = z + jnp.dot(h, whh, preferred_element_type=jnp.float32)      # (B, 4H)
    sg = _sigmoid(gates[:, :3 * HIDDEN])                                 # i | f | o
    g = jnp.tanh(gates[:, 3 * HIDDEN:])                                  # g
    i = sg[:, :HIDDEN]
    f = sg[:, HIDDEN:2 * HIDDEN]
    o = sg[:, 2 * HIDDEN:]
    c_new = f * c + i * g
    h_new = o * jnp.tanh(c_new)
    return h_new, c_new


def _run_bidir_layer(zf, zb, whh_f, whh_b, outf_ref, outb_ref):
    """Fwd + bwd recurrences of one layer, fully unrolled, states vreg-resident.

    zf / zb are (SB, 4H) batched input projections; per-step hidden outputs are
    staged into (SB, H) VMEM scratch (off the h->h critical path).
    """
    zero = jnp.zeros((BATCH, HIDDEN), jnp.float32)
    h_f, c_f, h_b, c_b = zero, zero, zero, zero
    for s in range(SEQ):
        r = SEQ - 1 - s
        h_f, c_f = _lstm_cell(zf[BATCH * s:BATCH * (s + 1), :], h_f, c_f, whh_f)
        h_b, c_b = _lstm_cell(zb[BATCH * r:BATCH * (r + 1), :], h_b, c_b, whh_b)
        outf_ref[BATCH * s:BATCH * (s + 1), :] = h_f
        outb_ref[BATCH * r:BATCH * (r + 1), :] = h_b


def _net_kernel(x_ref, p_ref, o_ref, h0f_buf, h0b_buf, h1f_buf, h1b_buf):
    f32 = jnp.float32
    x = x_ref[...]                                                       # (15, 10)

    # ---- layer 0: batched hoisted input projection (ONE matmul per dir) ------
    z0 = []
    for d in range(NUM_DIRS):
        wih0 = p_ref[ROW_WIH0[d]:ROW_WIH0[d] + INPUT, :]
        b0 = p_ref[ROW_B0[d]:ROW_B0[d] + 1, :]
        z0.append(jnp.dot(x, wih0, preferred_element_type=f32) + b0)     # (15, 80)

    whh0_f = p_ref[ROW_WHH0[0]:ROW_WHH0[0] + HIDDEN, :]
    whh0_b = p_ref[ROW_WHH0[1]:ROW_WHH0[1] + HIDDEN, :]
    _run_bidir_layer(z0[0], z0[1], whh0_f, whh0_b, h0f_buf, h0b_buf)

    H0F = h0f_buf[...]                                                   # (15, 20)
    H0B = h0b_buf[...]

    # ---- layer 1: batched hoisted projection of concat(fwd, bwd), no concat --
    z1 = []
    for d in range(NUM_DIRS):
        wih1a = p_ref[ROW_WIH1A[d]:ROW_WIH1A[d] + HIDDEN, :]
        wih1b = p_ref[ROW_WIH1B[d]:ROW_WIH1B[d] + HIDDEN, :]
        b1 = p_ref[ROW_B1[d]:ROW_B1[d] + 1, :]
        z1.append(jnp.dot(H0F, wih1a, preferred_element_type=f32)
                  + jnp.dot(H0B, wih1b, preferred_element_type=f32) + b1)

    whh1_f = p_ref[ROW_WHH1[0]:ROW_WHH1[0] + HIDDEN, :]
    whh1_b = p_ref[ROW_WHH1[1]:ROW_WHH1[1] + HIDDEN, :]
    _run_bidir_layer(z1[0], z1[1], whh1_f, whh1_b, h1f_buf, h1b_buf)

    H1F = h1f_buf[...]                                                   # (15, 20)
    H1B = h1b_buf[...]

    # ---- fc epilogue: wfc_f = [W^T | 0], wfc_b = [0 | W^T]; ONE (15,4) store --
    wfc_f = p_ref[ROW_WFC[0]:ROW_WFC[0] + HIDDEN, :][:, :OUT_W]
    wfc_b = p_ref[ROW_WFC[1]:ROW_WFC[1] + HIDDEN, :][:, :OUT_W]
    bfc = p_ref[ROW_BFC:ROW_BFC + 1, :][:, :OUT_W]
    o_ref[...] = (jnp.dot(H1F, wfc_f, preferred_element_type=f32)
                  + jnp.dot(H1B, wfc_b, preferred_element_type=f32) + bfc)


# ------------------------------ wrapper ----------------------------------------

@jax.jit
def net_forward(x, packed):
    x_flat = x.reshape(SB, INPUT)                          # (15, 10)
    out = pl.pallas_call(
        _net_kernel,
        out_shape=jax.ShapeDtypeStruct((SB, OUT_W), jnp.float32),
        in_specs=[pl.BlockSpec(memory_space=pltpu.MemorySpace.VMEM)] * 2,
        out_specs=pl.BlockSpec(memory_space=pltpu.MemorySpace.VMEM),
        scratch_shapes=[pltpu.VMEM((SB, HIDDEN), jnp.float32)] * 4,
    )(x_flat, packed)
    # (seq*batch, 4) -> (seq*batch*2, 2); identical row ordering to
    # fc(out.view(-1, 20)) in the PyTorch module.
    return out.reshape(SEQ * BATCH * NUM_DIRS, FC_OUT)


# --------------------- parameter init & kernel packing --------------------------

def init_raw_params(key):
    """PyTorch-layout parameters, uniform(-k, k) with k = 1/sqrt(H)."""
    raw = {}
    bound = HIDDEN ** -0.5
    for layer in range(NUM_LAYERS):
        in_dim = INPUT if layer == 0 else NUM_DIRS * HIDDEN
        for d in range(NUM_DIRS):
            key, k1, k2, k3, k4 = jax.random.split(key, 5)
            raw[f"l{layer}_d{d}"] = (
                jax.random.uniform(k1, (4 * HIDDEN, in_dim), jnp.float32, -bound, bound),
                jax.random.uniform(k2, (4 * HIDDEN, HIDDEN), jnp.float32, -bound, bound),
                jax.random.uniform(k3, (4 * HIDDEN,), jnp.float32, -bound, bound),
                jax.random.uniform(k4, (4 * HIDDEN,), jnp.float32, -bound, bound),
            )
    key, k5, k6 = jax.random.split(key, 3)
    raw["fc_w"] = jax.random.uniform(k5, (FC_OUT, HIDDEN), jnp.float32, -bound, bound)
    raw["fc_b"] = jax.random.uniform(k6, (FC_OUT,), jnp.float32, -bound, bound)
    return raw


def _pack_gate_w(w):
    """PyTorch (4H, D) with gate rows (i,f,g,o) -> (D, 4H) with gate cols (i,f,o,g)."""
    w4 = w.reshape(4, HIDDEN, w.shape[-1])[jnp.array(GATE_ORDER)]        # (4, H, D)
    return jnp.transpose(w4, (2, 0, 1)).reshape(w.shape[-1], G4)


def _pack_gate_b(b_ih, b_hh):
    b = (b_ih + b_hh).reshape(4, HIDDEN)[jnp.array(GATE_ORDER)]
    return b.reshape(1, G4)


def pack_params(raw):
    """Build the single packed (P_ROWS, 80) f32 parameter buffer."""
    P = jnp.zeros((P_ROWS, G4), jnp.float32)

    def put(buf, row, arr):
        return buf.at[row:row + arr.shape[0], :arr.shape[1]].set(arr)

    for d in range(NUM_DIRS):
        w_ih0, w_hh0, b_ih0, b_hh0 = raw[f"l0_d{d}"]
        P = put(P, ROW_WIH0[d], _pack_gate_w(w_ih0))                     # (10, 80)
        P = put(P, ROW_WHH0[d], _pack_gate_w(w_hh0))                     # (20, 80)
        P = put(P, ROW_B0[d], _pack_gate_b(b_ih0, b_hh0))                # (1, 80)

        w_ih1, w_hh1, b_ih1, b_hh1 = raw[f"l1_d{d}"]
        w1 = _pack_gate_w(w_ih1)                                         # (40, 80)
        P = put(P, ROW_WIH1A[d], w1[:HIDDEN])
        P = put(P, ROW_WIH1B[d], w1[HIDDEN:])
        P = put(P, ROW_WHH1[d], _pack_gate_w(w_hh1))
        P = put(P, ROW_B1[d], _pack_gate_b(b_ih1, b_hh1))

    fc_w_t = raw["fc_w"].T                                               # (20, 2)
    zpad = jnp.zeros((HIDDEN, FC_OUT), jnp.float32)
    P = put(P, ROW_WFC[0], jnp.concatenate([fc_w_t, zpad], axis=1))      # fwd cols 0:2
    P = put(P, ROW_WFC[1], jnp.concatenate([zpad, fc_w_t], axis=1))      # bwd cols 2:4
    P = put(P, ROW_BFC, jnp.concatenate([raw["fc_b"], raw["fc_b"]]).reshape(1, OUT_W))
    return P


# --------------------------- pure-JAX reference ---------------------------------

def _ref_lstm_dir(x, w_ih, w_hh, b_ih, b_hh):
    H = HIDDEN

    def step(carry, xt):
        h, c = carry
        g = xt @ w_ih.T + b_ih + h @ w_hh.T + b_hh
        i = jax.nn.sigmoid(g[:, :H])
        f = jax.nn.sigmoid(g[:, H:2 * H])
        gg = jnp.tanh(g[:, 2 * H:3 * H])
        o = jax.nn.sigmoid(g[:, 3 * H:])
        c = f * c + i * gg
        h = o * jnp.tanh(c)
        return (h, c), h

    init = (jnp.zeros((x.shape[1], H), jnp.float32),
            jnp.zeros((x.shape[1], H), jnp.float32))
    _, ys = lax.scan(step, init, x)
    return ys


def net_forward_ref(x, raw):
    layer_in = x
    for layer in range(NUM_LAYERS):
        outs = []
        for d in range(NUM_DIRS):
            w_ih, w_hh, b_ih, b_hh = raw[f"l{layer}_d{d}"]
            xin = layer_in if d == 0 else jnp.flip(layer_in, axis=0)
            o = _ref_lstm_dir(xin, w_ih, w_hh, b_ih, b_hh)
            if d == 1:
                o = jnp.flip(o, axis=0)
            outs.append(o)
        layer_in = jnp.concatenate(outs, axis=-1)          # (seq, batch, 2H)
    flat = layer_in.reshape(-1, HIDDEN)                    # == out.view(-1, 20)
    return flat @ raw["fc_w"].T + raw["fc_b"]              # (30, 2)


# ----------------------------------- main ----------------------------------------

if __name__ == "__main__":
    key = jax.random.PRNGKey(0)
    key, kx = jax.random.split(key)
    x = jax.random.normal(kx, (SEQ, BATCH, INPUT), jnp.float32)

    raw = init_raw_params(key)
    packed = pack_params(raw)

    out = jax.block_until_ready(net_forward(x, packed))
    ref = jax.block_until_ready(net_forward_ref(x, raw))

    assert out.shape == (SEQ * BATCH * NUM_DIRS, FC_OUT), out.shape
    max_err = float(jnp.max(jnp.abs(out - ref)))
    assert jnp.allclose(out, ref, atol=1e-4, rtol=1e-4), max_err
    print("KERNEL_OK")
</pallas_src>

<mosaic_0001>
module attributes {stable_mosaic.version = 11 : i64} {
  func.func @_net_kernel(%arg0: memref<15x10xf32, #tpu.memory_space<vmem>>, %arg1: memref<312x80xf32, #tpu.memory_space<vmem>>, %arg2: memref<15x4xf32, #tpu.memory_space<vmem>>, %arg3: memref<15x20xf32, #tpu.memory_space<vmem>>, %arg4: memref<15x20xf32, #tpu.memory_space<vmem>>, %arg5: memref<15x20xf32, #tpu.memory_space<vmem>>, %arg6: memref<15x20xf32, #tpu.memory_space<vmem>>) attributes {dimension_semantics = [], scalar_prefetch = 0 : i64, scratch_operands = 4 : i64, tpu.core_type = #tpu.core_type<tc>} {
    %c0 = arith.constant 0 : index
    %c0_0 = arith.constant 0 : index
    %0 = vector.load %arg0[%c0, %c0_0] : memref<15x10xf32, #tpu.memory_space<vmem>>, vector<15x10xf32>
    %c0_1 = arith.constant 0 : index
    %c0_2 = arith.constant 0 : index
    %1 = vector.load %arg1[%c0_1, %c0_2] : memref<312x80xf32, #tpu.memory_space<vmem>>, vector<10x80xf32>
    %c224 = arith.constant 224 : index
    %c0_3 = arith.constant 0 : index
    %2 = vector.load %arg1[%c224, %c0_3] : memref<312x80xf32, #tpu.memory_space<vmem>>, vector<1x80xf32>
    %cst = arith.constant dense<0.000000e+00> : vector<15x80xf32>
    %3 = tpu.matmul %0, %1, %cst {dimension_numbers = #tpu.dot_dimension_numbers<[1], [0], [0], [1], [0, 0, 1, 1], [], []>} : vector<15x10xf32>, vector<10x80xf32>, vector<15x80xf32> -> vector<15x80xf32>
    %4 = vector.broadcast %2 : vector<1x80xf32> to vector<15x80xf32>
    %5 = arith.addf %3, %4 : vector<15x80xf32>
    %c16 = arith.constant 16 : index
    %c0_4 = arith.constant 0 : index
    %6 = vector.load %arg1[%c16, %c0_4] : memref<312x80xf32, #tpu.memory_space<vmem>>, vector<10x80xf32>
    %c232 = arith.constant 232 : index
    %c0_5 = arith.constant 0 : index
    %7 = vector.load %arg1[%c232, %c0_5] : memref<312x80xf32, #tpu.memory_space<vmem>>, vector<1x80xf32>
    %cst_6 = arith.constant dense<0.000000e+00> : vector<15x80xf32>
    %8 = tpu.matmul %0, %6, %cst_6 {dimension_numbers = #tpu.dot_dimension_numbers<[1], [0], [0], [1], [0, 0, 1, 1], [], []>} : vector<15x10xf32>, vector<10x80xf32>, vector<15x80xf32> -> vector<15x80xf32>
    %9 = vector.broadcast %7 : vector<1x80xf32> to vector<15x80xf32>
    %10 = arith.addf %8, %9 : vector<15x80xf32>
    %c32 = arith.constant 32 : index
    %c0_7 = arith.constant 0 : index
    %11 = vector.load %arg1[%c32, %c0_7] : memref<312x80xf32, #tpu.memory_space<vmem>>, vector<20x80xf32>
    %c56 = arith.constant 56 : index
    %c0_8 = arith.constant 0 : index
    %12 = vector.load %arg1[%c56, %c0_8] : memref<312x80xf32, #tpu.memory_space<vmem>>, vector<20x80xf32>
    %cst_9 = arith.constant 0.000000e+00 : f32
    %13 = vector.broadcast %cst_9 : f32 to vector<3x20xf32>
    %14 = vector.extract_strided_slice %5 {offsets = [0, 0], sizes = [3, 80], strides = [1, 1]} : vector<15x80xf32> to vector<3x80xf32>
    %cst_10 = arith.constant dense<0.000000e+00> : vector<3x80xf32>
    %15 = tpu.matmul %13, %11, %cst_10 {dimension_numbers = #tpu.dot_dimension_numbers<[1], [0], [0], [1], [0, 0, 1, 1], [], []>} : vector<3x20xf32>, vector<20x80xf32>, vector<3x80xf32> -> vector<3x80xf32>
    %16 = arith.addf %14, %15 : vector<3x80xf32>
    %17 = vector.extract_strided_slice %16 {offsets = [0, 0], sizes = [3, 60], strides = [1, 1]} : vector<3x80xf32> to vector<3x60xf32>
    %cst_11 = arith.constant 5.000000e-01 : f32
    %18 = vector.broadcast %cst_11 : f32 to vector<3x60xf32>
    %19 = arith.mulf %18, %17 : vector<3x60xf32>
    %20 = math.tanh %19 : vector<3x60xf32>
    %cst_12 = arith.constant 5.000000e-01 : f32
    %21 = vector.broadcast %cst_12 : f32 to vector<3x60xf32>
    %22 = arith.mulf %21, %20 : vector<3x60xf32>
    %cst_13 = arith.constant 5.000000e-01 : f32
    %23 = vector.broadcast %cst_13 : f32 to vector<3x60xf32>
    %24 = arith.addf %22, %23 : vector<3x60xf32>
    %25 = vector.extract_strided_slice %16 {offsets = [0, 60], sizes = [3, 20], strides = [1, 1]} : vector<3x80xf32> to vector<3x20xf32>
    %26 = math.tanh %25 : vector<3x20xf32>
    %27 = vector.extract_strided_slice %24 {offsets = [0, 0], sizes = [3, 20], strides = [1, 1]} : vector<3x60xf32> to vector<3x20xf32>
    %28 = vector.extract_strided_slice %24 {offsets = [0, 20], sizes = [3, 20], strides = [1, 1]} : vector<3x60xf32> to vector<3x20xf32>
    %29 = vector.extract_strided_slice %24 {offsets = [0, 40], sizes = [3, 20], strides = [1, 1]} : vector<3x60xf32> to vector<3x20xf32>
    %30 = arith.mulf %28, %13 : vector<3x20xf32>
    %31 = arith.mulf %27, %26 : vector<3x20xf32>
    %32 = arith.addf %30, %31 : vector<3x20xf32>
    %33 = math.tanh %32 : vector<3x20xf32>
    %34 = arith.mulf %29, %33 : vector<3x20xf32>
    %35 = vector.extract_strided_slice %10 {offsets = [12, 0], sizes = [3, 80], strides = [1, 1]} : vector<15x80xf32> to vector<3x80xf32>
    %cst_14 = arith.constant dense<0.000000e+00> : vector<3x80xf32>
    %36 = tpu.matmul %13, %12, %cst_14 {dimension_numbers = #tpu.dot_dimension_numbers<[1], [0], [0], [1], [0, 0, 1, 1], [], []>} : vector<3x20xf32>, vector<20x80xf32>, vector<3x80xf32> -> vector<3x80xf32>
    %37 = arith.addf %35, %36 : vector<3x80xf32>
    %38 = vector.extract_strided_slice %37 {offsets = [0, 0], sizes = [3, 60], strides = [1, 1]} : vector<3x80xf32> to vector<3x60xf32>
    %cst_15 = arith.constant 5.000000e-01 : f32
    %39 = vector.broadcast %cst_15 : f32 to vector<3x60xf32>
    %40 = arith.mulf %39, %38 : vector<3x60xf32>
    %41 = math.tanh %40 : vector<3x60xf32>
    %cst_16 = arith.constant 5.000000e-01 : f32
    %42 = vector.broadcast %cst_16 : f32 to vector<3x60xf32>
    %43 = arith.mulf %42, %41 : vector<3x60xf32>
    %cst_17 = arith.constant 5.000000e-01 : f32
    %44 = vector.broadcast %cst_17 : f32 to vector<3x60xf32>
    %45 = arith.addf %43, %44 : vector<3x60xf32>
    %46 = vector.extract_strided_slice %37 {offsets = [0, 60], sizes = [3, 20], strides = [1, 1]} : vector<3x80xf32> to vector<3x20xf32>
    %47 = math.tanh %46 : vector<3x20xf32>
    %48 = vector.extract_strided_slice %45 {offsets = [0, 0], sizes = [3, 20], strides = [1, 1]} : vector<3x60xf32> to vector<3x20xf32>
    %49 = vector.extract_strided_slice %45 {offsets = [0, 20], sizes = [3, 20], strides = [1, 1]} : vector<3x60xf32> to vector<3x20xf32>
    %50 = vector.extract_strided_slice %45 {offsets = [0, 40], sizes = [3, 20], strides = [1, 1]} : vector<3x60xf32> to vector<3x20xf32>
    %51 = arith.mulf %49, %13 : vector<3x20xf32>
    %52 = arith.mulf %48, %47 : vector<3x20xf32>
    %53 = arith.addf %51, %52 : vector<3x20xf32>
    %54 = math.tanh %53 : vector<3x20xf32>
    %55 = arith.mulf %50, %54 : vector<3x20xf32>
    %c0_18 = arith.constant 0 : index
    %c0_19 = arith.constant 0 : index
    %56 = vector.load %arg3[%c0_18, %c0_19] : memref<15x20xf32, #tpu.memory_space<vmem>>, vector<3x20xf32>
    tpu.vector_store %arg3[%c0_18, %c0_19], %34 {strides = array<i32>} : memref<15x20xf32, #tpu.memory_space<vmem>>, vector<3x20xf32>,
    %c12 = arith.constant 12 : index
    %c0_20 = arith.constant 0 : index
    %57 = vector.load %arg4[%c12, %c0_20] : memref<15x20xf32, #tpu.memory_space<vmem>>, vector<3x20xf32>
    tpu.vector_store %arg4[%c12, %c0_20], %55 {strides = array<i32>} : memref<15x20xf32, #tpu.memory_space<vmem>>, vector<3x20xf32>,
    %58 = vector.extract_strided_slice %5 {offsets = [3, 0], sizes = [3, 80], strides = [1, 1]} : vector<15x80xf32> to vector<3x80xf32>
    %cst_21 = arith.constant dense<0.000000e+00> : vector<3x80xf32>
    %59 = tpu.matmul %34, %11, %cst_21 {dimension_numbers = #tpu.dot_dimension_numbers<[1], [0], [0], [1], [0, 0, 1, 1], [], []>} : vector<3x20xf32>, vector<20x80xf32>, vector<3x80xf32> -> vector<3x80xf32>
    %60 = arith.addf %58, %59 : vector<3x80xf32>
    %61 = vector.extract_strided_slice %60 {offsets = [0, 0], sizes = [3, 60], strides = [1, 1]} : vector<3x80xf32> to vector<3x60xf32>
    %cst_22 = arith.constant 5.000000e-01 : f32
    %62 = vector.broadcast %cst_22 : f32 to vector<3x60xf32>
    %63 = arith.mulf %62, %61 : vector<3x60xf32>
    %64 = math.tanh %63 : vector<3x60xf32>
    %cst_23 = arith.constant 5.000000e-01 : f32
    %65 = vector.broadcast %cst_23 : f32 to vector<3x60xf32>
    %66 = arith.mulf %65, %64 : vector<3x60xf32>
    %cst_24 = arith.constant 5.000000e-01 : f32
    %67 = vector.broadcast %cst_24 : f32 to vector<3x60xf32>
    %68 = arith.addf %66, %67 : vector<3x60xf32>
    %69 = vector.extract_strided_slice %60 {offsets = [0, 60], sizes = [3, 20], strides = [1, 1]} : vector<3x80xf32> to vector<3x20xf32>
    %70 = math.tanh %69 : vector<3x20xf32>
    %71 = vector.extract_strided_slice %68 {offsets = [0, 0], sizes = [3, 20], strides = [1, 1]} : vector<3x60xf32> to vector<3x20xf32>
    %72 = vector.extract_strided_slice %68 {offsets = [0, 20], sizes = [3, 20], strides = [1, 1]} : vector<3x60xf32> to vector<3x20xf32>
    %73 = vector.extract_strided_slice %68 {offsets = [0, 40], sizes = [3, 20], strides = [1, 1]} : vector<3x60xf32> to vector<3x20xf32>
    %74 = arith.mulf %72, %32 : vector<3x20xf32>
    %75 = arith.mulf %71, %70 : vector<3x20xf32>
    %76 = arith.addf %74, %75 : vector<3x20xf32>
    %77 = math.tanh %76 : vector<3x20xf32>
    %78 = arith.mulf %73, %77 : vector<3x20xf32>
    %79 = vector.extract_strided_slice %10 {offsets = [9, 0], sizes = [3, 80], strides = [1, 1]} : vector<15x80xf32> to vector<3x80xf32>
    %cst_25 = arith.constant dense<0.000000e+00> : vector<3x80xf32>
    %80 = tpu.matmul %55, %12, %cst_25 {dimension_numbers = #tpu.dot_dimension_numbers<[1], [0], [0], [1], [0, 0, 1, 1], [], []>} : vector<3x20xf32>, vector<20x80xf32>, vector<3x80xf32> -> vector<3x80xf32>
    %81 = arith.addf %79, %80 : vector<3x80xf32>
    %82 = vector.extract_strided_slice %81 {offsets = [0, 0], sizes = [3, 60], strides = [1, 1]} : vector<3x80xf32> to vector<3x60xf32>
    %cst_26 = arith.constant 5.000000e-01 : f32
    %83 = vector.broadcast %cst_26 : f32 to vector<3x60xf32>
    %84 = arith.mulf %83, %82 : vector<3x60xf32>
    %85 = math.tanh %84 : vector<3x60xf32>
    %cst_27 = arith.constant 5.000000e-01 : f32
    %86 = vector.broadcast %cst_27 : f32 to vector<3x60xf32>
    %87 = arith.mulf %86, %85 : vector<3x60xf32>
    %cst_28 = arith.constant 5.000000e-01 : f32
    %88 = vector.broadcast %cst_28 : f32 to vector<3x60xf32>
    %89 = arith.addf %87, %88 : vector<3x60xf32>
    %90 = vector.extract_strided_slice %81 {offsets = [0, 60], sizes = [3, 20], strides = [1, 1]} : vector<3x80xf32> to vector<3x20xf32>
    %91 = math.tanh %90 : vector<3x20xf32>
    %92 = vector.extract_strided_slice %89 {offsets = [0, 0], sizes = [3, 20], strides = [1, 1]} : vector<3x60xf32> to vector<3x20xf32>
    %93 = vector.extract_strided_slice %89 {offsets = [0, 20], sizes = [3, 20], strides = [1, 1]} : vector<3x60xf32> to vector<3x20xf32>
    %94 = vector.extract_strided_slice %89 {offsets = [0, 40], sizes = [3, 20], strides = [1, 1]} : vector<3x60xf32> to vector<3x20xf32>
    %95 = arith.mulf %93, %53 : vector<3x20xf32>
    %96 = arith.mulf %92, %91 : vector<3x20xf32>
    %97 = arith.addf %95, %96 : vector<3x20xf32>
    %98 = math.tanh %97 : vector<3x20xf32>
    %99 = arith.mulf %94, %98 : vector<3x20xf32>
    %c3 = arith.constant 3 : index
    %c0_29 = arith.constant 0 : index
    %100 = vector.load %arg3[%c3, %c0_29] : memref<15x20xf32, #tpu.memory_space<vmem>>, vector<3x20xf32>
    tpu.vector_store %arg3[%c3, %c0_29], %78 {strides = array<i32>} : memref<15x20xf32, #tpu.memory_space<vmem>>, vector<3x20xf32>,
    %c9 = arith.constant 9 : index
    %c0_30 = arith.constant 0 : index
    %101 = vector.load %arg4[%c9, %c0_30] : memref<15x20xf32, #tpu.memory_space<vmem>>, vector<3x20xf32>
    tpu.vector_store %arg4[%c9, %c0_30], %99 {strides = array<i32>} : memref<15x20xf32, #tpu.memory_space<vmem>>, vector<3x20xf32>,
    %102 = vector.extract_strided_slice %5 {offsets = [6, 0], sizes = [3, 80], strides = [1, 1]} : vector<15x80xf32> to vector<3x80xf32>
    %cst_31 = arith.constant dense<0.000000e+00> : vector<3x80xf32>
    %103 = tpu.matmul %78, %11, %cst_31 {dimension_numbers = #tpu.dot_dimension_numbers<[1], [0], [0], [1], [0, 0, 1, 1], [], []>} : vector<3x20xf32>, vector<20x80xf32>, vector<3x80xf32> -> vector<3x80xf32>
    %104 = arith.addf %102, %103 : vector<3x80xf32>
    %105 = vector.extract_strided_slice %104 {offsets = [0, 0], sizes = [3, 60], strides = [1, 1]} : vector<3x80xf32> to vector<3x60xf32>
    %cst_32 = arith.constant 5.000000e-01 : f32
    %106 = vector.broadcast %cst_32 : f32 to vector<3x60xf32>
    %107 = arith.mulf %106, %105 : vector<3x60xf32>
    %108 = math.tanh %107 : vector<3x60xf32>
    %cst_33 = arith.constant 5.000000e-01 : f32
    %109 = vector.broadcast %cst_33 : f32 to vector<3x60xf32>
    %110 = arith.mulf %109, %108 : vector<3x60xf32>
    %cst_34 = arith.constant 5.000000e-01 : f32
    %111 = vector.broadcast %cst_34 : f32 to vector<3x60xf32>
    %112 = arith.addf %110, %111 : vector<3x60xf32>
    %113 = vector.extract_strided_slice %104 {offsets = [0, 60], sizes = [3, 20], strides = [1, 1]} : vector<3x80xf32> to vector<3x20xf32>
    %114 = math.tanh %113 : vector<3x20xf32>
    %115 = vector.extract_strided_slice %112 {offsets = [0, 0], sizes = [3, 20], strides = [1, 1]} : vector<3x60xf32> to vector<3x20xf32>
    %116 = vector.extract_strided_slice %112 {offsets = [0, 20], sizes = [3, 20], strides = [1, 1]} : vector<3x60xf32> to vector<3x20xf32>
    %117 = vector.extract_strided_slice %112 {offsets = [0, 40], sizes = [3, 20], strides = [1, 1]} : vector<3x60xf32> to vector<3x20xf32>
    %118 = arith.mulf %116, %76 : vector<3x20xf32>
    %119 = arith.mulf %115, %114 : vector<3x20xf32>
    %120 = arith.addf %118, %119 : vector<3x20xf32>
    %121 = math.tanh %120 : vector<3x20xf32>
    %122 = arith.mulf %117, %121 : vector<3x20xf32>
    %123 = vector.extract_strided_slice %10 {offsets = [6, 0], sizes = [3, 80], strides = [1, 1]} : vector<15x80xf32> to vector<3x80xf32>
    %cst_35 = arith.constant dense<0.000000e+00> : vector<3x80xf32>
    %124 = tpu.matmul %99, %12, %cst_35 {dimension_numbers = #tpu.dot_dimension_numbers<[1], [0], [0], [1], [0, 0, 1, 1], [], []>} : vector<3x20xf32>, vector<20x80xf32>, vector<3x80xf32> -> vector<3x80xf32>
    %125 = arith.addf %123, %124 : vector<3x80xf32>
    %126 = vector.extract_strided_slice %125 {offsets = [0, 0], sizes = [3, 60], strides = [1, 1]} : vector<3x80xf32> to vector<3x60xf32>
    %cst_36 = arith.constant 5.000000e-01 : f32
    %127 = vector.broadcast %cst_36 : f32 to vector<3x60xf32>
    %128 = arith.mulf %127, %126 : vector<3x60xf32>
    %129 = math.tanh %128 : vector<3x60xf32>
    %cst_37 = arith.constant 5.000000e-01 : f32
    %130 = vector.broadcast %cst_37 : f32 to vector<3x60xf32>
    %131 = arith.mulf %130, %129 : vector<3x60xf32>
    %cst_38 = arith.constant 5.000000e-01 : f32
    %132 = vector.broadcast %cst_38 : f32 to vector<3x60xf32>
    %133 = arith.addf %131, %132 : vector<3x60xf32>
    %134 = vector.extract_strided_slice %125 {offsets = [0, 60], sizes = [3, 20], strides = [1, 1]} : vector<3x80xf32> to vector<3x20xf32>
    %135 = math.tanh %134 : vector<3x20xf32>
    %136 = vector.extract_strided_slice %133 {offsets = [0, 0], sizes = [3, 20], strides = [1, 1]} : vector<3x60xf32> to vector<3x20xf32>
    %137 = vector.extract_strided_slice %133 {offsets = [0, 20], sizes = [3, 20], strides = [1, 1]} : vector<3x60xf32> to vector<3x20xf32>
    %138 = vector.extract_strided_slice %133 {offsets = [0, 40], sizes = [3, 20], strides = [1, 1]} : vector<3x60xf32> to vector<3x20xf32>
    %139 = arith.mulf %137, %97 : vector<3x20xf32>
    %140 = arith.mulf %136, %135 : vector<3x20xf32>
    %141 = arith.addf %139, %140 : vector<3x20xf32>
    %142 = math.tanh %141 : vector<3x20xf32>
    %143 = arith.mulf %138, %142 : vector<3x20xf32>
    %c6 = arith.constant 6 : index
    %c0_39 = arith.constant 0 : index
    %144 = vector.load %arg3[%c6, %c0_39] : memref<15x20xf32, #tpu.memory_space<vmem>>, vector<3x20xf32>
    tpu.vector_store %arg3[%c6, %c0_39], %122 {strides = array<i32>} : memref<15x20xf32, #tpu.memory_space<vmem>>, vector<3x20xf32>,
    %c6_40 = arith.constant 6 : index
    %c0_41 = arith.constant 0 : index
    %145 = vector.load %arg4[%c6_40, %c0_41] : memref<15x20xf32, #tpu.memory_space<vmem>>, vector<3x20xf32>
    tpu.vector_store %arg4[%c6_40, %c0_41], %143 {strides = array<i32>} : memref<15x20xf32, #tpu.memory_space<vmem>>, vector<3x20xf32>,
    %146 = vector.extract_strided_slice %5 {offsets = [9, 0], sizes = [3, 80], strides = [1, 1]} : vector<15x80xf32> to vector<3x80xf32>
    %cst_42 = arith.constant dense<0.000000e+00> : vector<3x80xf32>
    %147 = tpu.matmul %122, %11, %cst_42 {dimension_numbers = #tpu.dot_dimension_numbers<[1], [0], [0], [1], [0, 0, 1, 1], [], []>} : vector<3x20xf32>, vector<20x80xf32>, vector<3x80xf32> -> vector<3x80xf32>
    %148 = arith.addf %146, %147 : vector<3x80xf32>
    %149 = vector.extract_strided_slice %148 {offsets = [0, 0], sizes = [3, 60], strides = [1, 1]} : vector<3x80xf32> to vector<3x60xf32>
    %cst_43 = arith.constant 5.000000e-01 : f32
    %150 = vector.broadcast %cst_43 : f32 to vector<3x60xf32>
    %151 = arith.mulf %150, %149 : vector<3x60xf32>
    %152 = math.tanh %151 : vector<3x60xf32>
    %cst_44 = arith.constant 5.000000e-01 : f32
    %153 = vector.broadcast %cst_44 : f32 to vector<3x60xf32>
    %154 = arith.mulf %153, %152 : vector<3x60xf32>
    %cst_45 = arith.constant 5.000000e-01 : f32
    %155 = vector.broadcast %cst_45 : f32 to vector<3x60xf32>
    %156 = arith.addf %154, %155 : vector<3x60xf32>
    %157 = vector.extract_strided_slice %148 {offsets = [0, 60], sizes = [3, 20], strides = [1, 1]} : vector<3x80xf32> to vector<3x20xf32>
    %158 = math.tanh %157 : vector<3x20xf32>
    %159 = vector.extract_strided_slice %156 {offsets = [0, 0], sizes = [3, 20], strides = [1, 1]} : vector<3x60xf32> to vector<3x20xf32>
    %160 = vector.extract_strided_slice %156 {offsets = [0, 20], sizes = [3, 20], strides = [1, 1]} : vector<3x60xf32> to vector<3x20xf32>
    %161 = vector.extract_strided_slice %156 {offsets = [0, 40], sizes = [3, 20], strides = [1, 1]} : vector<3x60xf32> to vector<3x20xf32>
    %162 = arith.mulf %160, %120 : vector<3x20xf32>
    %163 = arith.mulf %159, %158 : vector<3x20xf32>
    %164 = arith.addf %162, %163 : vector<3x20xf32>
    %165 = math.tanh %164 : vector<3x20xf32>
    %166 = arith.mulf %161, %165 : vector<3x20xf32>
    %167 = vector.extract_strided_slice %10 {offsets = [3, 0], sizes = [3, 80], strides = [1, 1]} : vector<15x80xf32> to vector<3x80xf32>
    %cst_46 = arith.constant dense<0.000000e+00> : vector<3x80xf32>
    %168 = tpu.matmul %143, %12, %cst_46 {dimension_numbers = #tpu.dot_dimension_numbers<[1], [0], [0], [1], [0, 0, 1, 1], [], []>} : vector<3x20xf32>, vector<20x80xf32>, vector<3x80xf32> -> vector<3x80xf32>
    %169 = arith.addf %167, %168 : vector<3x80xf32>
    %170 = vector.extract_strided_slice %169 {offsets = [0, 0], sizes = [3, 60], strides = [1, 1]} : vector<3x80xf32> to vector<3x60xf32>
    %cst_47 = arith.constant 5.000000e-01 : f32
    %171 = vector.broadcast %cst_47 : f32 to vector<3x60xf32>
    %172 = arith.mulf %171, %170 : vector<3x60xf32>
    %173 = math.tanh %172 : vector<3x60xf32>
    %cst_48 = arith.constant 5.000000e-01 : f32
    %174 = vector.broadcast %cst_48 : f32 to vector<3x60xf32>
    %175 = arith.mulf %174, %173 : vector<3x60xf32>
    %cst_49 = arith.constant 5.000000e-01 : f32
    %176 = vector.broadcast %cst_49 : f32 to vector<3x60xf32>
    %177 = arith.addf %175, %176 : vector<3x60xf32>
    %178 = vector.extract_strided_slice %169 {offsets = [0, 60], sizes = [3, 20], strides = [1, 1]} : vector<3x80xf32> to vector<3x20xf32>
    %179 = math.tanh %178 : vector<3x20xf32>
    %180 = vector.extract_strided_slice %177 {offsets = [0, 0], sizes = [3, 20], strides = [1, 1]} : vector<3x60xf32> to vector<3x20xf32>
    %181 = vector.extract_strided_slice %177 {offsets = [0, 20], sizes = [3, 20], strides = [1, 1]} : vector<3x60xf32> to vector<3x20xf32>
    %182 = vector.extract_strided_slice %177 {offsets = [0, 40], sizes = [3, 20], strides = [1, 1]} : vector<3x60xf32> to vector<3x20xf32>
    %183 = arith.mulf %181, %141 : vector<3x20xf32>
    %184 = arith.mulf %180, %179 : vector<3x20xf32>
    %185 = arith.addf %183, %184 : vector<3x20xf32>
    %186 = math.tanh %185 : vector<3x20xf32>
    %187 = arith.mulf %182, %186 : vector<3x20xf32>
    %c9_50 = arith.constant 9 : index
    %c0_51 = arith.constant 0 : index
    %188 = vector.load %arg3[%c9_50, %c0_51] : memref<15x20xf32, #tpu.memory_space<vmem>>, vector<3x20xf32>
    tpu.vector_store %arg3[%c9_50, %c0_51], %166 {strides = array<i32>} : memref<15x20xf32, #tpu.memory_space<vmem>>, vector<3x20xf32>,
    %c3_52 = arith.constant 3 : index
    %c0_53 = arith.constant 0 : index
    %189 = vector.load %arg4[%c3_52, %c0_53] : memref<15x20xf32, #tpu.memory_space<vmem>>, vector<3x20xf32>
    tpu.vector_store %arg4[%c3_52, %c0_53], %187 {strides = array<i32>} : memref<15x20xf32, #tpu.memory_space<vmem>>, vector<3x20xf32>,
    %190 = vector.extract_strided_slice %5 {offsets = [12, 0], sizes = [3, 80], strides = [1, 1]} : vector<15x80xf32> to vector<3x80xf32>
    %cst_54 = arith.constant dense<0.000000e+00> : vector<3x80xf32>
    %191 = tpu.matmul %166, %11, %cst_54 {dimension_numbers = #tpu.dot_dimension_numbers<[1], [0], [0], [1], [0, 0, 1, 1], [], []>} : vector<3x20xf32>, vector<20x80xf32>, vector<3x80xf32> -> vector<3x80xf32>
    %192 = arith.addf %190, %191 : vector<3x80xf32>
    %193 = vector.extract_strided_slice %192 {offsets = [0, 0], sizes = [3, 60], strides = [1, 1]} : vector<3x80xf32> to vector<3x60xf32>
    %cst_55 = arith.constant 5.000000e-01 : f32
    %194 = vector.broadcast %cst_55 : f32 to vector<3x60xf32>
    %195 = arith.mulf %194, %193 : vector<3x60xf32>
    %196 = math.tanh %195 : vector<3x60xf32>
    %cst_56 = arith.constant 5.000000e-01 : f32
    %197 = vector.broadcast %cst_56 : f32 to vector<3x60xf32>
    %198 = arith.mulf %197, %196 : vector<3x60xf32>
    %cst_57 = arith.constant 5.000000e-01 : f32
    %199 = vector.broadcast %cst_57 : f32 to vector<3x60xf32>
    %200 = arith.addf %198, %199 : vector<3x60xf32>
    %201 = vector.extract_strided_slice %192 {offsets = [0, 60], sizes = [3, 20], strides = [1, 1]} : vector<3x80xf32> to vector<3x20xf32>
    %202 = math.tanh %201 : vector<3x20xf32>
    %203 = vector.extract_strided_slice %200 {offsets = [0, 0], sizes = [3, 20], strides = [1, 1]} : vector<3x60xf32> to vector<3x20xf32>
    %204 = vector.extract_strided_slice %200 {offsets = [0, 20], sizes = [3, 20], strides = [1, 1]} : vector<3x60xf32> to vector<3x20xf32>
    %205 = vector.extract_strided_slice %200 {offsets = [0, 40], sizes = [3, 20], strides = [1, 1]} : vector<3x60xf32> to vector<3x20xf32>
    %206 = arith.mulf %204, %164 : vector<3x20xf32>
    %207 = arith.mulf %203, %202 : vector<3x20xf32>
    %208 = arith.addf %206, %207 : vector<3x20xf32>
    %209 = math.tanh %208 : vector<3x20xf32>
    %210 = arith.mulf %205, %209 : vector<3x20xf32>
    %211 = vector.extract_strided_slice %10 {offsets = [0, 0], sizes = [3, 80], strides = [1, 1]} : vector<15x80xf32> to vector<3x80xf32>
    %cst_58 = arith.constant dense<0.000000e+00> : vector<3x80xf32>
    %212 = tpu.matmul %187, %12, %cst_58 {dimension_numbers = #tpu.dot_dimension_numbers<[1], [0], [0], [1], [0, 0, 1, 1], [], []>} : vector<3x20xf32>, vector<20x80xf32>, vector<3x80xf32> -> vector<3x80xf32>
    %213 = arith.addf %211, %212 : vector<3x80xf32>
    %214 = vector.extract_strided_slice %213 {offsets = [0, 0], sizes = [3, 60], strides = [1, 1]} : vector<3x80xf32> to vector<3x60xf32>
    %cst_59 = arith.constant 5.000000e-01 : f32
    %215 = vector.broadcast %cst_59 : f32 to vector<3x60xf32>
    %216 = arith.mulf %215, %214 : vector<3x60xf32>
    %217 = math.tanh %216 : vector<3x60xf32>
    %cst_60 = arith.constant 5.000000e-01 : f32
    %218 = vector.broadcast %cst_60 : f32 to vector<3x60xf32>
    %219 = arith.mulf %218, %217 : vector<3x60xf32>
    %cst_61 = arith.constant 5.000000e-01 : f32
    %220 = vector.broadcast %cst_61 : f32 to vector<3x60xf32>
    %221 = arith.addf %219, %220 : vector<3x60xf32>
    %222 = vector.extract_strided_slice %213 {offsets = [0, 60], sizes = [3, 20], strides = [1, 1]} : vector<3x80xf32> to vector<3x20xf32>
    %223 = math.tanh %222 : vector<3x20xf32>
    %224 = vector.extract_strided_slice %221 {offsets = [0, 0], sizes = [3, 20], strides = [1, 1]} : vector<3x60xf32> to vector<3x20xf32>
    %225 = vector.extract_strided_slice %221 {offsets = [0, 20], sizes = [3, 20], strides = [1, 1]} : vector<3x60xf32> to vector<3x20xf32>
    %226 = vector.extract_strided_slice %221 {offsets = [0, 40], sizes = [3, 20], strides = [1, 1]} : vector<3x60xf32> to vector<3x20xf32>
    %227 = arith.mulf %225, %185 : vector<3x20xf32>
    %228 = arith.mulf %224, %223 : vector<3x20xf32>
    %229 = arith.addf %227, %228 : vector<3x20xf32>
    %230 = math.tanh %229 : vector<3x20xf32>
    %231 = arith.mulf %226, %230 : vector<3x20xf32>
    %c12_62 = arith.constant 12 : index
    %c0_63 = arith.constant 0 : index
    %232 = vector.load %arg3[%c12_62, %c0_63] : memref<15x20xf32, #tpu.memory_space<vmem>>, vector<3x20xf32>
    tpu.vector_store %arg3[%c12_62, %c0_63], %210 {strides = array<i32>} : memref<15x20xf32, #tpu.memory_space<vmem>>, vector<3x20xf32>,
    %c0_64 = arith.constant 0 : index
    %c0_65 = arith.constant 0 : index
    %233 = vector.load %arg4[%c0_64, %c0_65] : memref<15x20xf32, #tpu.memory_space<vmem>>, vector<3x20xf32>
    tpu.vector_store %arg4[%c0_64, %c0_65], %231 {strides = array<i32>} : memref<15x20xf32, #tpu.memory_space<vmem>>, vector<3x20xf32>,
    %c0_66 = arith.constant 0 : index
    %c0_67 = arith.constant 0 : index
    %234 = vector.load %arg3[%c0_66, %c0_67] : memref<15x20xf32, #tpu.memory_space<vmem>>, vector<15x20xf32>
    %c0_68 = arith.constant 0 : index
    %c0_69 = arith.constant 0 : index
    %235 = vector.load %arg4[%c0_68, %c0_69] : memref<15x20xf32, #tpu.memory_space<vmem>>, vector<15x20xf32>
    %c80 = arith.constant 80 : index
    %c0_70 = arith.constant 0 : index
    %236 = vector.load %arg1[%c80, %c0_70] : memref<312x80xf32, #tpu.memory_space<vmem>>, vector<20x80xf32>
    %c104 = arith.constant 104 : index
    %c0_71 = arith.constant 0 : index
    %237 = vector.load %arg1[%c104, %c0_71] : memref<312x80xf32, #tpu.memory_space<vmem>>, vector<20x80xf32>
    %c240 = arith.constant 240 : index
    %c0_72 = arith.constant 0 : index
    %238 = vector.load %arg1[%c240, %c0_72] : memref<312x80xf32, #tpu.memory_space<vmem>>, vector<1x80xf32>
    %cst_73 = arith.constant dense<0.000000e+00> : vector<15x80xf32>
    %239 = tpu.matmul %234, %236, %cst_73 {dimension_numbers = #tpu.dot_dimension_numbers<[1], [0], [0], [1], [0, 0, 1, 1], [], []>} : vector<15x20xf32>, vector<20x80xf32>, vector<15x80xf32> -> vector<15x80xf32>
    %cst_74 = arith.constant dense<0.000000e+00> : vector<15x80xf32>
    %240 = tpu.matmul %235, %237, %cst_74 {dimension_numbers = #tpu.dot_dimension_numbers<[1], [0], [0], [1], [0, 0, 1, 1], [], []>} : vector<15x20xf32>, vector<20x80xf32>, vector<15x80xf32> -> vector<15x80xf32>
    %241 = arith.addf %239, %240 : vector<15x80xf32>
    %242 = vector.broadcast %238 : vector<1x80xf32> to vector<15x80xf32>
    %243 = arith.addf %241, %242 : vector<15x80xf32>
    %c128 = arith.constant 128 : index
    %c0_75 = arith.constant 0 : index
    %244 = vector.load %arg1[%c128, %c0_75] : memref<312x80xf32, #tpu.memory_space<vmem>>, vector<20x80xf32>
    %c152 = arith.constant 152 : index
    %c0_76 = arith.constant 0 : index
    %245 = vector.load %arg1[%c152, %c0_76] : memref<312x80xf32, #tpu.memory_space<vmem>>, vector<20x80xf32>
    %c248 = arith.constant 248 : index
    %c0_77 = arith.constant 0 : index
    %246 = vector.load %arg1[%c248, %c0_77] : memref<312x80xf32, #tpu.memory_space<vmem>>, vector<1x80xf32>
    %cst_78 = arith.constant dense<0.000000e+00> : vector<15x80xf32>
    %247 = tpu.matmul %234, %244, %cst_78 {dimension_numbers = #tpu.dot_dimension_numbers<[1], [0], [0], [1], [0, 0, 1, 1], [], []>} : vector<15x20xf32>, vector<20x80xf32>, vector<15x80xf32> -> vector<15x80xf32>
    %cst_79 = arith.constant dense<0.000000e+00> : vector<15x80xf32>
    %248 = tpu.matmul %235, %245, %cst_79 {dimension_numbers = #tpu.dot_dimension_numbers<[1], [0], [0], [1], [0, 0, 1, 1], [], []>} : vector<15x20xf32>, vector<20x80xf32>, vector<15x80xf32> -> vector<15x80xf32>
    %249 = arith.addf %247, %248 : vector<15x80xf32>
    %250 = vector.broadcast %246 : vector<1x80xf32> to vector<15x80xf32>
    %251 = arith.addf %249, %250 : vector<15x80xf32>
    %c176 = arith.constant 176 : index
    %c0_80 = arith.constant 0 : index
    %252 = vector.load %arg1[%c176, %c0_80] : memref<312x80xf32, #tpu.memory_space<vmem>>, vector<20x80xf32>
    %c200 = arith.constant 200 : index
    %c0_81 = arith.constant 0 : index
    %253 = vector.load %arg1[%c200, %c0_81] : memref<312x80xf32, #tpu.memory_space<vmem>>, vector<20x80xf32>
    %cst_82 = arith.constant 0.000000e+00 : f32
    %254 = vector.broadcast %cst_82 : f32 to vector<3x20xf32>
    %255 = vector.extract_strided_slice %243 {offsets = [0, 0], sizes = [3, 80], strides = [1, 1]} : vector<15x80xf32> to vector<3x80xf32>
    %cst_83 = arith.constant dense<0.000000e+00> : vector<3x80xf32>
    %256 = tpu.matmul %254, %252, %cst_83 {dimension_numbers = #tpu.dot_dimension_numbers<[1], [0], [0], [1], [0, 0, 1, 1], [], []>} : vector<3x20xf32>, vector<20x80xf32>, vector<3x80xf32> -> vector<3x80xf32>
    %257 = arith.addf %255, %256 : vector<3x80xf32>
    %258 = vector.extract_strided_slice %257 {offsets = [0, 0], sizes = [3, 60], strides = [1, 1]} : vector<3x80xf32> to vector<3x60xf32>
    %cst_84 = arith.constant 5.000000e-01 : f32
    %259 = vector.broadcast %cst_84 : f32 to vector<3x60xf32>
    %260 = arith.mulf %259, %258 : vector<3x60xf32>
    %261 = math.tanh %260 : vector<3x60xf32>
    %cst_85 = arith.constant 5.000000e-01 : f32
    %262 = vector.broadcast %cst_85 : f32 to vector<3x60xf32>
    %263 = arith.mulf %262, %261 : vector<3x60xf32>
    %cst_86 = arith.constant 5.000000e-01 : f32
    %264 = vector.broadcast %cst_86 : f32 to vector<3x60xf32>
    %265 = arith.addf %263, %264 : vector<3x60xf32>
    %266 = vector.extract_strided_slice %257 {offsets = [0, 60], sizes = [3, 20], strides = [1, 1]} : vector<3x80xf32> to vector<3x20xf32>
    %267 = math.tanh %266 : vector<3x20xf32>
    %268 = vector.extract_strided_slice %265 {offsets = [0, 0], sizes = [3, 20], strides = [1, 1]} : vector<3x60xf32> to vector<3x20xf32>
    %269 = vector.extract_strided_slice %265 {offsets = [0, 20], sizes = [3, 20], strides = [1, 1]} : vector<3x60xf32> to vector<3x20xf32>
    %270 = vector.extract_strided_slice %265 {offsets = [0, 40], sizes = [3, 20], strides = [1, 1]} : vector<3x60xf32> to vector<3x20xf32>
    %271 = arith.mulf %269, %254 : vector<3x20xf32>
    %272 = arith.mulf %268, %267 : vector<3x20xf32>
    %273 = arith.addf %271, %272 : vector<3x20xf32>
    %274 = math.tanh %273 : vector<3x20xf32>
    %275 = arith.mulf %270, %274 : vector<3x20xf32>
    %276 = vector.extract_strided_slice %251 {offsets = [12, 0], sizes = [3, 80], strides = [1, 1]} : vector<15x80xf32> to vector<3x80xf32>
    %cst_87 = arith.constant dense<0.000000e+00> : vector<3x80xf32>
    %277 = tpu.matmul %254, %253, %cst_87 {dimension_numbers = #tpu.dot_dimension_numbers<[1], [0], [0], [1], [0, 0, 1, 1], [], []>} : vector<3x20xf32>, vector<20x80xf32>, vector<3x80xf32> -> vector<3x80xf32>
    %278 = arith.addf %276, %277 : vector<3x80xf32>
    %279 = vector.extract_strided_slice %278 {offsets = [0, 0], sizes = [3, 60], strides = [1, 1]} : vector<3x80xf32> to vector<3x60xf32>
    %cst_88 = arith.constant 5.000000e-01 : f32
    %280 = vector.broadcast %cst_88 : f32 to vector<3x60xf32>
    %281 = arith.mulf %280, %279 : vector<3x60xf32>
    %282 = math.tanh %281 : vector<3x60xf32>
    %cst_89 = arith.constant 5.000000e-01 : f32
    %283 = vector.broadcast %cst_89 : f32 to vector<3x60xf32>
    %284 = arith.mulf %283, %282 : vector<3x60xf32>
    %cst_90 = arith.constant 5.000000e-01 : f32
    %285 = vector.broadcast %cst_90 : f32 to vector<3x60xf32>
    %286 = arith.addf %284, %285 : vector<3x60xf32>
    %287 = vector.extract_strided_slice %278 {offsets = [0, 60], sizes = [3, 20], strides = [1, 1]} : vector<3x80xf32> to vector<3x20xf32>
    %288 = math.tanh %287 : vector<3x20xf32>
    %289 = vector.extract_strided_slice %286 {offsets = [0, 0], sizes = [3, 20], strides = [1, 1]} : vector<3x60xf32> to vector<3x20xf32>
    %290 = vector.extract_strided_slice %286 {offsets = [0, 20], sizes = [3, 20], strides = [1, 1]} : vector<3x60xf32> to vector<3x20xf32>
    %291 = vector.extract_strided_slice %286 {offsets = [0, 40], sizes = [3, 20], strides = [1, 1]} : vector<3x60xf32> to vector<3x20xf32>
    %292 = arith.mulf %290, %254 : vector<3x20xf32>
    %293 = arith.mulf %289, %288 : vector<3x20xf32>
    %294 = arith.addf %292, %293 : vector<3x20xf32>
    %295 = math.tanh %294 : vector<3x20xf32>
    %296 = arith.mulf %291, %295 : vector<3x20xf32>
    %c0_91 = arith.constant 0 : index
    %c0_92 = arith.constant 0 : index
    %297 = vector.load %arg5[%c0_91, %c0_92] : memref<15x20xf32, #tpu.memory_space<vmem>>, vector<3x20xf32>
    tpu.vector_store %arg5[%c0_91, %c0_92], %275 {strides = array<i32>} : memref<15x20xf32, #tpu.memory_space<vmem>>, vector<3x20xf32>,
    %c12_93 = arith.constant 12 : index
    %c0_94 = arith.constant 0 : index
    %298 = vector.load %arg6[%c12_93, %c0_94] : memref<15x20xf32, #tpu.memory_space<vmem>>, vector<3x20xf32>
    tpu.vector_store %arg6[%c12_93, %c0_94], %296 {strides = array<i32>} : memref<15x20xf32, #tpu.memory_space<vmem>>, vector<3x20xf32>,
    %299 = vector.extract_strided_slice %243 {offsets = [3, 0], sizes = [3, 80], strides = [1, 1]} : vector<15x80xf32> to vector<3x80xf32>
    %cst_95 = arith.constant dense<0.000000e+00> : vector<3x80xf32>
    %300 = tpu.matmul %275, %252, %cst_95 {dimension_numbers = #tpu.dot_dimension_numbers<[1], [0], [0], [1], [0, 0, 1, 1], [], []>} : vector<3x20xf32>, vector<20x80xf32>, vector<3x80xf32> -> vector<3x80xf32>
    %301 = arith.addf %299, %300 : vector<3x80xf32>
    %302 = vector.extract_strided_slice %301 {offsets = [0, 0], sizes = [3, 60], strides = [1, 1]} : vector<3x80xf32> to vector<3x60xf32>
    %cst_96 = arith.constant 5.000000e-01 : f32
    %303 = vector.broadcast %cst_96 : f32 to vector<3x60xf32>
    %304 = arith.mulf %303, %302 : vector<3x60xf32>
    %305 = math.tanh %304 : vector<3x60xf32>
    %cst_97 = arith.constant 5.000000e-01 : f32
    %306 = vector.broadcast %cst_97 : f32 to vector<3x60xf32>
    %307 = arith.mulf %306, %305 : vector<3x60xf32>
    %cst_98 = arith.constant 5.000000e-01 : f32
    %308 = vector.broadcast %cst_98 : f32 to vector<3x60xf32>
    %309 = arith.addf %307, %308 : vector<3x60xf32>
    %310 = vector.extract_strided_slice %301 {offsets = [0, 60], sizes = [3, 20], strides = [1, 1]} : vector<3x80xf32> to vector<3x20xf32>
    %311 = math.tanh %310 : vector<3x20xf32>
    %312 = vector.extract_strided_slice %309 {offsets = [0, 0], sizes = [3, 20], strides = [1, 1]} : vector<3x60xf32> to vector<3x20xf32>
    %313 = vector.extract_strided_slice %309 {offsets = [0, 20], sizes = [3, 20], strides = [1, 1]} : vector<3x60xf32> to vector<3x20xf32>
    %314 = vector.extract_strided_slice %309 {offsets = [0, 40], sizes = [3, 20], strides = [1, 1]} : vector<3x60xf32> to vector<3x20xf32>
    %315 = arith.mulf %313, %273 : vector<3x20xf32>
    %316 = arith.mulf %312, %311 : vector<3x20xf32>
    %317 = arith.addf %315, %316 : vector<3x20xf32>
    %318 = math.tanh %317 : vector<3x20xf32>
    %319 = arith.mulf %314, %318 : vector<3x20xf32>
    %320 = vector.extract_strided_slice %251 {offsets = [9, 0], sizes = [3, 80], strides = [1, 1]} : vector<15x80xf32> to vector<3x80xf32>
    %cst_99 = arith.constant dense<0.000000e+00> : vector<3x80xf32>
    %321 = tpu.matmul %296, %253, %cst_99 {dimension_numbers = #tpu.dot_dimension_numbers<[1], [0], [0], [1], [0, 0, 1, 1], [], []>} : vector<3x20xf32>, vector<20x80xf32>, vector<3x80xf32> -> vector<3x80xf32>
    %322 = arith.addf %320, %321 : vector<3x80xf32>
    %323 = vector.extract_strided_slice %322 {offsets = [0, 0], sizes = [3, 60], strides = [1, 1]} : vector<3x80xf32> to vector<3x60xf32>
    %cst_100 = arith.constant 5.000000e-01 : f32
    %324 = vector.broadcast %cst_100 : f32 to vector<3x60xf32>
    %325 = arith.mulf %324, %323 : vector<3x60xf32>
    %326 = math.tanh %325 : vector<3x60xf32>
    %cst_101 = arith.constant 5.000000e-01 : f32
    %327 = vector.broadcast %cst_101 : f32 to vector<3x60xf32>
    %328 = arith.mulf %327, %326 : vector<3x60xf32>
    %cst_102 = arith.constant 5.000000e-01 : f32
    %329 = vector.broadcast %cst_102 : f32 to vector<3x60xf32>
    %330 = arith.addf %328, %329 : vector<3x60xf32>
    %331 = vector.extract_strided_slice %322 {offsets = [0, 60], sizes = [3, 20], strides = [1, 1]} : vector<3x80xf32> to vector<3x20xf32>
    %332 = math.tanh %331 : vector<3x20xf32>
    %333 = vector.extract_strided_slice %330 {offsets = [0, 0], sizes = [3, 20], strides = [1, 1]} : vector<3x60xf32> to vector<3x20xf32>
    %334 = vector.extract_strided_slice %330 {offsets = [0, 20], sizes = [3, 20], strides = [1, 1]} : vector<3x60xf32> to vector<3x20xf32>
    %335 = vector.extract_strided_slice %330 {offsets = [0, 40], sizes = [3, 20], strides = [1, 1]} : vector<3x60xf32> to vector<3x20xf32>
    %336 = arith.mulf %334, %294 : vector<3x20xf32>
    %337 = arith.mulf %333, %332 : vector<3x20xf32>
    %338 = arith.addf %336, %337 : vector<3x20xf32>
    %339 = math.tanh %338 : vector<3x20xf32>
    %340 = arith.mulf %335, %339 : vector<3x20xf32>
    %c3_103 = arith.constant 3 : index
    %c0_104 = arith.constant 0 : index
    %341 = vector.load %arg5[%c3_103, %c0_104] : memref<15x20xf32, #tpu.memory_space<vmem>>, vector<3x20xf32>
    tpu.vector_store %arg5[%c3_103, %c0_104], %319 {strides = array<i32>} : memref<15x20xf32, #tpu.memory_space<vmem>>, vector<3x20xf32>,
    %c9_105 = arith.constant 9 : index
    %c0_106 = arith.constant 0 : index
    %342 = vector.load %arg6[%c9_105, %c0_106] : memref<15x20xf32, #tpu.memory_space<vmem>>, vector<3x20xf32>
    tpu.vector_store %arg6[%c9_105, %c0_106], %340 {strides = array<i32>} : memref<15x20xf32, #tpu.memory_space<vmem>>, vector<3x20xf32>,
    %343 = vector.extract_strided_slice %243 {offsets = [6, 0], sizes = [3, 80], strides = [1, 1]} : vector<15x80xf32> to vector<3x80xf32>
    %cst_107 = arith.constant dense<0.000000e+00> : vector<3x80xf32>
    %344 = tpu.matmul %319, %252, %cst_107 {dimension_numbers = #tpu.dot_dimension_numbers<[1], [0], [0], [1], [0, 0, 1, 1], [], []>} : vector<3x20xf32>, vector<20x80xf32>, vector<3x80xf32> -> vector<3x80xf32>
    %345 = arith.addf %343, %344 : vector<3x80xf32>
    %346 = vector.extract_strided_slice %345 {offsets = [0, 0], sizes = [3, 60], strides = [1, 1]} : vector<3x80xf32> to vector<3x60xf32>
    %cst_108 = arith.constant 5.000000e-01 : f32
    %347 = vector.broadcast %cst_108 : f32 to vector<3x60xf32>
    %348 = arith.mulf %347, %346 : vector<3x60xf32>
    %349 = math.tanh %348 : vector<3x60xf32>
    %cst_109 = arith.constant 5.000000e-01 : f32
    %350 = vector.broadcast %cst_109 : f32 to vector<3x60xf32>
    %351 = arith.mulf %350, %349 : vector<3x60xf32>
    %cst_110 = arith.constant 5.000000e-01 : f32
    %352 = vector.broadcast %cst_110 : f32 to vector<3x60xf32>
    %353 = arith.addf %351, %352 : vector<3x60xf32>
    %354 = vector.extract_strided_slice %345 {offsets = [0, 60], sizes = [3, 20], strides = [1, 1]} : vector<3x80xf32> to vector<3x20xf32>
    %355 = math.tanh %354 : vector<3x20xf32>
    %356 = vector.extract_strided_slice %353 {offsets = [0, 0], sizes = [3, 20], strides = [1, 1]} : vector<3x60xf32> to vector<3x20xf32>
    %357 = vector.extract_strided_slice %353 {offsets = [0, 20], sizes = [3, 20], strides = [1, 1]} : vector<3x60xf32> to vector<3x20xf32>
    %358 = vector.extract_strided_slice %353 {offsets = [0, 40], sizes = [3, 20], strides = [1, 1]} : vector<3x60xf32> to vector<3x20xf32>
    %359 = arith.mulf %357, %317 : vector<3x20xf32>
    %360 = arith.mulf %356, %355 : vector<3x20xf32>
    %361 = arith.addf %359, %360 : vector<3x20xf32>
    %362 = math.tanh %361 : vector<3x20xf32>
    %363 = arith.mulf %358, %362 : vector<3x20xf32>
    %364 = vector.extract_strided_slice %251 {offsets = [6, 0], sizes = [3, 80], strides = [1, 1]} : vector<15x80xf32> to vector<3x80xf32>
    %cst_111 = arith.constant dense<0.000000e+00> : vector<3x80xf32>
    %365 = tpu.matmul %340, %253, %cst_111 {dimension_numbers = #tpu.dot_dimension_numbers<[1], [0], [0], [1], [0, 0, 1, 1], [], []>} : vector<3x20xf32>, vector<20x80xf32>, vector<3x80xf32> -> vector<3x80xf32>
    %366 = arith.addf %364, %365 : vector<3x80xf32>
    %367 = vector.extract_strided_slice %366 {offsets = [0, 0], sizes = [3, 60], strides = [1, 1]} : vector<3x80xf32> to vector<3x60xf32>
    %cst_112 = arith.constant 5.000000e-01 : f32
    %368 = vector.broadcast %cst_112 : f32 to vector<3x60xf32>
    %369 = arith.mulf %368, %367 : vector<3x60xf32>
    %370 = math.tanh %369 : vector<3x60xf32>
    %cst_113 = arith.constant 5.000000e-01 : f32
    %371 = vector.broadcast %cst_113 : f32 to vector<3x60xf32>
    %372 = arith.mulf %371, %370 : vector<3x60xf32>
    %cst_114 = arith.constant 5.000000e-01 : f32
    %373 = vector.broadcast %cst_114 : f32 to vector<3x60xf32>
    %374 = arith.addf %372, %373 : vector<3x60xf32>
    %375 = vector.extract_strided_slice %366 {offsets = [0, 60], sizes = [3, 20], strides = [1, 1]} : vector<3x80xf32> to vector<3x20xf32>
    %376 = math.tanh %375 : vector<3x20xf32>
    %377 = vector.extract_strided_slice %374 {offsets = [0, 0], sizes = [3, 20], strides = [1, 1]} : vector<3x60xf32> to vector<3x20xf32>
    %378 = vector.extract_strided_slice %374 {offsets = [0, 20], sizes = [3, 20], strides = [1, 1]} : vector<3x60xf32> to vector<3x20xf32>
    %379 = vector.extract_strided_slice %374 {offsets = [0, 40], sizes = [3, 20], strides = [1, 1]} : vector<3x60xf32> to vector<3x20xf32>
    %380 = arith.mulf %378, %338 : vector<3x20xf32>
    %381 = arith.mulf %377, %376 : vector<3x20xf32>
    %382 = arith.addf %380, %381 : vector<3x20xf32>
    %383 = math.tanh %382 : vector<3x20xf32>
    %384 = arith.mulf %379, %383 : vector<3x20xf32>
    %c6_115 = arith.constant 6 : index
    %c0_116 = arith.constant 0 : index
    %385 = vector.load %arg5[%c6_115, %c0_116] : memref<15x20xf32, #tpu.memory_space<vmem>>, vector<3x20xf32>
    tpu.vector_store %arg5[%c6_115, %c0_116], %363 {strides = array<i32>} : memref<15x20xf32, #tpu.memory_space<vmem>>, vector<3x20xf32>,
    %c6_117 = arith.constant 6 : index
    %c0_118 = arith.constant 0 : index
    %386 = vector.load %arg6[%c6_117, %c0_118] : memref<15x20xf32, #tpu.memory_space<vmem>>, vector<3x20xf32>
    tpu.vector_store %arg6[%c6_117, %c0_118], %384 {strides = array<i32>} : memref<15x20xf32, #tpu.memory_space<vmem>>, vector<3x20xf32>,
    %387 = vector.extract_strided_slice %243 {offsets = [9, 0], sizes = [3, 80], strides = [1, 1]} : vector<15x80xf32> to vector<3x80xf32>
    %cst_119 = arith.constant dense<0.000000e+00> : vector<3x80xf32>
    %388 = tpu.matmul %363, %252, %cst_119 {dimension_numbers = #tpu.dot_dimension_numbers<[1], [0], [0], [1], [0, 0, 1, 1], [], []>} : vector<3x20xf32>, vector<20x80xf32>, vector<3x80xf32> -> vector<3x80xf32>
    %389 = arith.addf %387, %388 : vector<3x80xf32>
    %390 = vector.extract_strided_slice %389 {offsets = [0, 0], sizes = [3, 60], strides = [1, 1]} : vector<3x80xf32> to vector<3x60xf32>
    %cst_120 = arith.constant 5.000000e-01 : f32
    %391 = vector.broadcast %cst_120 : f32 to vector<3x60xf32>
    %392 = arith.mulf %391, %390 : vector<3x60xf32>
    %393 = math.tanh %392 : vector<3x60xf32>
    %cst_121 = arith.constant 5.000000e-01 : f32
    %394 = vector.broadcast %cst_121 : f32 to vector<3x60xf32>
    %395 = arith.mulf %394, %393 : vector<3x60xf32>
    %cst_122 = arith.constant 5.000000e-01 : f32
    %396 = vector.broadcast %cst_122 : f32 to vector<3x60xf32>
    %397 = arith.addf %395, %396 : vector<3x60xf32>
    %398 = vector.extract_strided_slice %389 {offsets = [0, 60], sizes = [3, 20], strides = [1, 1]} : vector<3x80xf32> to vector<3x20xf32>
    %399 = math.tanh %398 : vector<3x20xf32>
    %400 = vector.extract_strided_slice %397 {offsets = [0, 0], sizes = [3, 20], strides = [1, 1]} : vector<3x60xf32> to vector<3x20xf32>
    %401 = vector.extract_strided_slice %397 {offsets = [0, 20], sizes = [3, 20], strides = [1, 1]} : vector<3x60xf32> to vector<3x20xf32>
    %402 = vector.extract_strided_slice %397 {offsets = [0, 40], sizes = [3, 20], strides = [1, 1]} : vector<3x60xf32> to vector<3x20xf32>
    %403 = arith.mulf %401, %361 : vector<3x20xf32>
    %404 = arith.mulf %400, %399 : vector<3x20xf32>
    %405 = arith.addf %403, %404 : vector<3x20xf32>
    %406 = math.tanh %405 : vector<3x20xf32>
    %407 = arith.mulf %402, %406 : vector<3x20xf32>
    %408 = vector.extract_strided_slice %251 {offsets = [3, 0], sizes = [3, 80], strides = [1, 1]} : vector<15x80xf32> to vector<3x80xf32>
    %cst_123 = arith.constant dense<0.000000e+00> : vector<3x80xf32>
    %409 = tpu.matmul %384, %253, %cst_123 {dimension_numbers = #tpu.dot_dimension_numbers<[1], [0], [0], [1], [0, 0, 1, 1], [], []>} : vector<3x20xf32>, vector<20x80xf32>, vector<3x80xf32> -> vector<3x80xf32>
    %410 = arith.addf %408, %409 : vector<3x80xf32>
    %411 = vector.extract_strided_slice %410 {offsets = [0, 0], sizes = [3, 60], strides = [1, 1]} : vector<3x80xf32> to vector<3x60xf32>
    %cst_124 = arith.constant 5.000000e-01 : f32
    %412 = vector.broadcast %cst_124 : f32 to vector<3x60xf32>
    %413 = arith.mulf %412, %411 : vector<3x60xf32>
    %414 = math.tanh %413 : vector<3x60xf32>
    %cst_125 = arith.constant 5.000000e-01 : f32
    %415 = vector.broadcast %cst_125 : f32 to vector<3x60xf32>
    %416 = arith.mulf %415, %414 : vector<3x60xf32>
    %cst_126 = arith.constant 5.000000e-01 : f32
    %417 = vector.broadcast %cst_126 : f32 to vector<3x60xf32>
    %418 = arith.addf %416, %417 : vector<3x60xf32>
    %419 = vector.extract_strided_slice %410 {offsets = [0, 60], sizes = [3, 20], strides = [1, 1]} : vector<3x80xf32> to vector<3x20xf32>
    %420 = math.tanh %419 : vector<3x20xf32>
    %421 = vector.extract_strided_slice %418 {offsets = [0, 0], sizes = [3, 20], strides = [1, 1]} : vector<3x60xf32> to vector<3x20xf32>
    %422 = vector.extract_strided_slice %418 {offsets = [0, 20], sizes = [3, 20], strides = [1, 1]} : vector<3x60xf32> to vector<3x20xf32>
    %423 = vector.extract_strided_slice %418 {offsets = [0, 40], sizes = [3, 20], strides = [1, 1]} : vector<3x60xf32> to vector<3x20xf32>
    %424 = arith.mulf %422, %382 : vector<3x20xf32>
    %425 = arith.mulf %421, %420 : vector<3x20xf32>
    %426 = arith.addf %424, %425 : vector<3x20xf32>
    %427 = math.tanh %426 : vector<3x20xf32>
    %428 = arith.mulf %423, %427 : vector<3x20xf32>
    %c9_127 = arith.constant 9 : index
    %c0_128 = arith.constant 0 : index
    %429 = vector.load %arg5[%c9_127, %c0_128] : memref<15x20xf32, #tpu.memory_space<vmem>>, vector<3x20xf32>
    tpu.vector_store %arg5[%c9_127, %c0_128], %407 {strides = array<i32>} : memref<15x20xf32, #tpu.memory_space<vmem>>, vector<3x20xf32>,
    %c3_129 = arith.constant 3 : index
    %c0_130 = arith.constant 0 : index
    %430 = vector.load %arg6[%c3_129, %c0_130] : memref<15x20xf32, #tpu.memory_space<vmem>>, vector<3x20xf32>
    tpu.vector_store %arg6[%c3_129, %c0_130], %428 {strides = array<i32>} : memref<15x20xf32, #tpu.memory_space<vmem>>, vector<3x20xf32>,
    %431 = vector.extract_strided_slice %243 {offsets = [12, 0], sizes = [3, 80], strides = [1, 1]} : vector<15x80xf32> to vector<3x80xf32>
    %cst_131 = arith.constant dense<0.000000e+00> : vector<3x80xf32>
    %432 = tpu.matmul %407, %252, %cst_131 {dimension_numbers = #tpu.dot_dimension_numbers<[1], [0], [0], [1], [0, 0, 1, 1], [], []>} : vector<3x20xf32>, vector<20x80xf32>, vector<3x80xf32> -> vector<3x80xf32>
    %433 = arith.addf %431, %432 : vector<3x80xf32>
    %434 = vector.extract_strided_slice %433 {offsets = [0, 0], sizes = [3, 60], strides = [1, 1]} : vector<3x80xf32> to vector<3x60xf32>
    %cst_132 = arith.constant 5.000000e-01 : f32
    %435 = vector.broadcast %cst_132 : f32 to vector<3x60xf32>
    %436 = arith.mulf %435, %434 : vector<3x60xf32>
    %437 = math.tanh %436 : vector<3x60xf32>
    %cst_133 = arith.constant 5.000000e-01 : f32
    %438 = vector.broadcast %cst_133 : f32 to vector<3x60xf32>
    %439 = arith.mulf %438, %437 : vector<3x60xf32>
    %cst_134 = arith.constant 5.000000e-01 : f32
    %440 = vector.broadcast %cst_134 : f32 to vector<3x60xf32>
    %441 = arith.addf %439, %440 : vector<3x60xf32>
    %442 = vector.extract_strided_slice %433 {offsets = [0, 60], sizes = [3, 20], strides = [1, 1]} : vector<3x80xf32> to vector<3x20xf32>
    %443 = math.tanh %442 : vector<3x20xf32>
    %444 = vector.extract_strided_slice %441 {offsets = [0, 0], sizes = [3, 20], strides = [1, 1]} : vector<3x60xf32> to vector<3x20xf32>
    %445 = vector.extract_strided_slice %441 {offsets = [0, 20], sizes = [3, 20], strides = [1, 1]} : vector<3x60xf32> to vector<3x20xf32>
    %446 = vector.extract_strided_slice %441 {offsets = [0, 40], sizes = [3, 20], strides = [1, 1]} : vector<3x60xf32> to vector<3x20xf32>
    %447 = arith.mulf %445, %405 : vector<3x20xf32>
    %448 = arith.mulf %444, %443 : vector<3x20xf32>
    %449 = arith.addf %447, %448 : vector<3x20xf32>
    %450 = math.tanh %449 : vector<3x20xf32>
    %451 = arith.mulf %446, %450 : vector<3x20xf32>
    %452 = vector.extract_strided_slice %251 {offsets = [0, 0], sizes = [3, 80], strides = [1, 1]} : vector<15x80xf32> to vector<3x80xf32>
    %cst_135 = arith.constant dense<0.000000e+00> : vector<3x80xf32>
    %453 = tpu.matmul %428, %253, %cst_135 {dimension_numbers = #tpu.dot_dimension_numbers<[1], [0], [0], [1], [0, 0, 1, 1], [], []>} : vector<3x20xf32>, vector<20x80xf32>, vector<3x80xf32> -> vector<3x80xf32>
    %454 = arith.addf %452, %453 : vector<3x80xf32>
    %455 = vector.extract_strided_slice %454 {offsets = [0, 0], sizes = [3, 60], strides = [1, 1]} : vector<3x80xf32> to vector<3x60xf32>
    %cst_136 = arith.constant 5.000000e-01 : f32
    %456 = vector.broadcast %cst_136 : f32 to vector<3x60xf32>
    %457 = arith.mulf %456, %455 : vector<3x60xf32>
    %458 = math.tanh %457 : vector<3x60xf32>
    %cst_137 = arith.constant 5.000000e-01 : f32
    %459 = vector.broadcast %cst_137 : f32 to vector<3x60xf32>
    %460 = arith.mulf %459, %458 : vector<3x60xf32>
    %cst_138 = arith.constant 5.000000e-01 : f32
    %461 = vector.broadcast %cst_138 : f32 to vector<3x60xf32>
    %462 = arith.addf %460, %461 : vector<3x60xf32>
    %463 = vector.extract_strided_slice %454 {offsets = [0, 60], sizes = [3, 20], strides = [1, 1]} : vector<3x80xf32> to vector<3x20xf32>
    %464 = math.tanh %463 : vector<3x20xf32>
    %465 = vector.extract_strided_slice %462 {offsets = [0, 0], sizes = [3, 20], strides = [1, 1]} : vector<3x60xf32> to vector<3x20xf32>
    %466 = vector.extract_strided_slice %462 {offsets = [0, 20], sizes = [3, 20], strides = [1, 1]} : vector<3x60xf32> to vector<3x20xf32>
    %467 = vector.extract_strided_slice %462 {offsets = [0, 40], sizes = [3, 20], strides = [1, 1]} : vector<3x60xf32> to vector<3x20xf32>
    %468 = arith.mulf %466, %426 : vector<3x20xf32>
    %469 = arith.mulf %465, %464 : vector<3x20xf32>
    %470 = arith.addf %468, %469 : vector<3x20xf32>
    %471 = math.tanh %470 : vector<3x20xf32>
    %472 = arith.mulf %467, %471 : vector<3x20xf32>
    %c12_139 = arith.constant 12 : index
    %c0_140 = arith.constant 0 : index
    %473 = vector.load %arg5[%c12_139, %c0_140] : memref<15x20xf32, #tpu.memory_space<vmem>>, vector<3x20xf32>
    tpu.vector_store %arg5[%c12_139, %c0_140], %451 {strides = array<i32>} : memref<15x20xf32, #tpu.memory_space<vmem>>, vector<3x20xf32>,
    %c0_141 = arith.constant 0 : index
    %c0_142 = arith.constant 0 : index
    %474 = vector.load %arg6[%c0_141, %c0_142] : memref<15x20xf32, #tpu.memory_space<vmem>>, vector<3x20xf32>
    tpu.vector_store %arg6[%c0_141, %c0_142], %472 {strides = array<i32>} : memref<15x20xf32, #tpu.memory_space<vmem>>, vector<3x20xf32>,
    %c0_143 = arith.constant 0 : index
    %c0_144 = arith.constant 0 : index
    %475 = vector.load %arg5[%c0_143, %c0_144] : memref<15x20xf32, #tpu.memory_space<vmem>>, vector<15x20xf32>
    %c0_145 = arith.constant 0 : index
    %c0_146 = arith.constant 0 : index
    %476 = vector.load %arg6[%c0_145, %c0_146] : memref<15x20xf32, #tpu.memory_space<vmem>>, vector<15x20xf32>
    %c256 = arith.constant 256 : index
    %c0_147 = arith.constant 0 : index
    %477 = vector.load %arg1[%c256, %c0_147] : memref<312x80xf32, #tpu.memory_space<vmem>>, vector<20x80xf32>
    %478 = vector.extract_strided_slice %477 {offsets = [0, 0], sizes = [20, 4], strides = [1, 1]} : vector<20x80xf32> to vector<20x4xf32>
    %c280 = arith.constant 280 : index
    %c0_148 = arith.constant 0 : index
    %479 = vector.load %arg1[%c280, %c0_148] : memref<312x80xf32, #tpu.memory_space<vmem>>, vector<20x80xf32>
    %480 = vector.extract_strided_slice %479 {offsets = [0, 0], sizes = [20, 4], strides = [1, 1]} : vector<20x80xf32> to vector<20x4xf32>
    %c304 = arith.constant 304 : index
    %c0_149 = arith.constant 0 : index
    %481 = vector.load %arg1[%c304, %c0_149] : memref<312x80xf32, #tpu.memory_space<vmem>>, vector<1x80xf32>
    %482 = vector.extract_strided_slice %481 {offsets = [0, 0], sizes = [1, 4], strides = [1, 1]} : vector<1x80xf32> to vector<1x4xf32>
    %cst_150 = arith.constant dense<0.000000e+00> : vector<15x4xf32>
    %483 = tpu.matmul %475, %478, %cst_150 {dimension_numbers = #tpu.dot_dimension_numbers<[1], [0], [0], [1], [0, 0, 1, 1], [], []>} : vector<15x20xf32>, vector<20x4xf32>, vector<15x4xf32> -> vector<15x4xf32>
    %cst_151 = arith.constant dense<0.000000e+00> : vector<15x4xf32>
    %484 = tpu.matmul %476, %480, %cst_151 {dimension_numbers = #tpu.dot_dimension_numbers<[1], [0], [0], [1], [0, 0, 1, 1], [], []>} : vector<15x20xf32>, vector<20x4xf32>, vector<15x4xf32> -> vector<15x4xf32>
    %485 = arith.addf %483, %484 : vector<15x4xf32>
    %486 = vector.broadcast %482 : vector<1x4xf32> to vector<15x4xf32>
    %487 = arith.addf %485, %486 : vector<15x4xf32>
    %c0_152 = arith.constant 0 : index
    %c0_153 = arith.constant 0 : index
    %488 = vector.load %arg2[%c0_152, %c0_153] : memref<15x4xf32, #tpu.memory_space<vmem>>, vector<15x4xf32>
    tpu.vector_store %arg2[%c0_152, %c0_153], %487 {strides = array<i32>} : memref<15x4xf32, #tpu.memory_space<vmem>>, vector<15x4xf32>,
    return
  }
}

</mosaic_0001>

<bundles_post_ra>
// kernel: net_forward.1
= control target key start
LH: loop header
LB: loop body
LE: loop exit
PB: predicated region body
PF: predicated region fallthrough
CT: control target
= control target key end

     0   :  { %vm27_vm0 = vcmask 1041408   ;;  %vm20_vm1 = vcmask 80896   ;;  %vm3721_vm2 = vmmov 1   ;;  %v3722_v12 = vmov 0.0|0.0   ;;  %s3725_s8 = smov 68   ;;  %s3726_s9 = smov 20   ;;  %s4376_s1 = inlined_call_operand.vmem [shape: f32[312,80], index: 1, kind: input, shape index: {}]   ;;  %s4377_s0 = inlined_call_operand.vmem [shape: f32[15,10], index: 0, kind: input, shape index: {}]   ;;  %s4378_s2 = inlined_call_operand.vmem [shape: f32[15,4], index: 2, kind: output, shape index: {}]  }
   0x1   :  { %vm3744_vm3 = vmpackc.low %vm27_vm0, %vm3721_vm2  ;;  %v106_v1 = vld [vmem:[%s4376_s1 + $0x10] sm:$0xff]  ;;  %v107_v2 = vld [vmem:[%s4376_s1 + $0x18] sm:$0x3]  ;;  %vm3723_vm4 = vmmov 0   ;;  %v3724_v15 = vmov 0.0   ;;  %vm201_vm5 = vcmask 1043456  }
   0x2   :  { %v3474_v3 = vpack.c.bf16 %v107_v2, %v106_v1  ;;  %v11_v4 = vld [vmem:[%s4377_s0] sm:$0xff]  ;;  %v14_v6 = vld [vmem:[%s4376_s1 + $0x8] sm:$0x3]  ;;  %v194_v13 = vld [vmem:[%s4376_s1 + $0x38] sm:$0xff]  ;;  %s3727_s10 = smov 88   ;;  %vm197_vm6 = vcmask 162816  }
   0x3   :  { %v13_v5 = vld [vmem:[%s4376_s1] sm:$0xff]  ;;  %3231 = vmatprep.mubr.msk.f32.mxu1 %vm20_vm1, %v11_v4  ;;  %v192_v8 = vld [vmem:[%s4376_s1 + $0x28] sm:$0xff]  ;;  %3224 = vmatprep.mubr.msk.f32.mxu0 %vm20_vm1, %v11_v4  ;;  %v3801_v16 = vld [vmem:[%s4376_s1 + $0x30] sm:$0xf]  ;;  %vm401_vm7 = vcmask 157696   ;;  %vm1100_vm8 = vcmask 1044480  }
   0x4   :  { %v191_v7 = vld [vmem:[%s4376_s1 + $0x20] sm:$0xff]  ;;  %3476 = vmatprep.subr.msk.bf16.mxu1 %vm3744_vm3, %v3474_v3  ;;  %v3468_v9 = vpack.c.bf16 %v14_v6, %v13_v5  ;;  %v12_v10 = vld [vmem:[%s4377_s0 + $0x8] sm:$0x7f]  ;;  %vm990_vm9 = vcmask 1042432   ;;  %vm888_vm10 = vcmask 162822   ;;  %vm624_vm11 = vcmask 158721  }
   0x5   :  { %3479 = vmatpush3.bf16.msk.msra.mxu1 %vm3744_vm3, %v3474_v3  ;;  %v3778_v11 = vpack.c.bf16 %v192_v8, %v191_v7  ;;  %v195_v14 = vld [vmem:[%s4376_s1 + $0x40] sm:$0xff]  ;;  %v3820_v18 = vld [vmem:[%s4376_s1 + $0x48] sm:$0xf]  ;;  %vm618_vm12 = vcmask 160771   ;;  %vm407_vm13 = vcmask 161796   ;;  %vm890_vm14 = vcmask 155648  }
   0x6   :  { %3470 = vmatprep.subr.msk.bf16.mxu0 %vm3744_vm3, %v3468_v9  ;;  %3480 = vmatprep.subr.bf16.mxu1 %v3722_v12  ;;  %v3803_v17 = vpack.c.bf16 %v195_v14, %v194_v13  ;;  %v3041_v19 = vld [vmem:[%s4376_s1 + $0xe8] ss:$0 sm:$0xff]  ;;  %v3037_v24 = vld [vmem:[%s4376_s1 + $0xe0] ss:$0 sm:$0xff]  ;;  %vm3031_vm15 = vcmask 30720  }
   0x7   :  { %3473 = vmatpush3.bf16.msk.msra.mxu0 %vm3744_vm3, %v3468_v9 }
   0x8   :  { %3232 = vmatmul.mubr.msk.f32.vlgmr.msra.gmra.mrb[0].mxu1 %vm20_vm1, %v12_v10  ;;  %3486 = vmatprep.subr.bf16.mxu0 %v3722_v12 }
   0x9   :  { %3482 = vmatpush3.bf16.msra.mxu1 %v3778_v11  ;;  %3240 = vmatprep.mubr.msk.f32.mxu1 %vm3723_vm4, %v3724_v15 }
   0xa   :  { %3225 = vmatmul.mubr.msk.f32.vlgmr.msra.gmra.mrb[0].mxu0 %vm20_vm1, %v12_v10  ;;  %3238 = vmatprep.subr.mxu1 %v3724_v15 }
   0xb   :  { %3488 = vmatpush3.bf16.msra.mxu0 %v3778_v11  ;;  %3258 = vmatprep.mubr.msk.f32.mxu0 %vm3723_vm4, %v3724_v15 }
   0xc   :  { %3256 = vmatprep.subr.mxu0 %v3724_v15 }
   0xd   :  { %3239 = vmatpush3.msk.msra.mxu1 %vm201_vm5, %v3801_v16 }
   0xe   :  { %3241 = vmatmul.mubr.f32.vlgmr.msra.gmra.mrb[2].mxu1 %v3724_v15  ;;  %3483 = vmatprep.subr.bf16.mxu1 %v3722_v12 }
   0xf   :  { %3485 = vmatpush3.bf16.msra.mxu1 %v3803_v17  ;;  %3249 = vmatprep.mubr.msk.f32.mxu1 %vm3723_vm4, %v3724_v15 }
  0x10   :  { %3247 = vmatprep.subr.mxu1 %v3724_v15  ;;  %3257 = vmatpush3.msk.msra.mxu0 %vm201_vm5, %v3801_v16 }
  0x11   :  { %3492 = vmatprep.subr.bf16.mxu0 %v3722_v12 }
  0x13   :  { %3248 = vmatpush3.msk.msra.mxu1 %vm201_vm5, %v3820_v18 }
  0x14   :  { %3250 = vmatmul.mubr.f32.vlgmr.msra.gmra.mrb[4].mxu1 %v3724_v15  ;;  %3489 = vmatprep.subr.bf16.mxu1 %v3722_v12 }
  0x15   :  { %3491 = vmatpush3.bf16.msra.mxu1 %v3803_v17  ;;  %3267 = vmatprep.mubr.msk.f32.mxu1 %vm3723_vm4, %v3724_v15 }
  0x16   :  { %3265 = vmatprep.subr.mxu1 %v3724_v15 }
  0x19   :  { %3266 = vmatpush3.msk.msra.mxu1 %vm201_vm5, %v3820_v18 }
  0x1a   :  { %3495 = vmatprep.subr.bf16.mxu1 %v3722_v12 }
  0xdb   :  { %v3233_v20 = vpop.f32.mrb[0].mxu1 }
  0xdc   :  { %v182_v21 = vpop.f32.mrb[1].mxu1  ;;  %v3846_v30 = vadd.f32 %v3233_v20, %v3041_v19 }
  0xdd   :  { %v3839_v22 = vadd.f32 %v3041_v19, %v182_v21  ;;  %v3226_v23 = vpop.f32.mrb[0].mxu0 }
  0xde   :  { %v3844_v25 = vadd.f32 %v3226_v23, %v3037_v24  ;;  %v97_v26 = vpop.f32.mrb[1].mxu0 }
  0xdf   :  { %v3848_v31 = vadd.f32 %v3037_v24, %v97_v26 }
  0xe1   :  { %v271_v27 = vpop.f32.mrb[2].mxu1 }
  0xe2   :  { %v3242_v28 = vpop.f32.mrb[3].mxu1  ;;  %v275_v35 = vadd.f32 %v271_v27, %v3848_v31 }
  0xe4   :  { %v276_v39 = vmul.f32 0.5, %v275_v35 }
  0xe7   :  { %v367_v29 = vpop.f32.mrb[4].mxu1 }
  0xe8   :  { %v372_v32 = vrot.slane %v367_v29, 4  ;;  %v3251_v33 = vpop.f32.mrb[5].mxu1 }
  0xea   :  { %v374_v34 = vadd.f32 %v372_v32, %v3846_v30 }
  0xec   :  { %3577 = vtanh.f32 %v374_v34  ;;  %v375_v38 = vmul.f32 0.5, %v374_v34 }
  0xed   :  { %3579 = vtanh.f32 %v275_v35 }
  0xee   :  { %3581 = vtanh.f32 %v375_v38 }
  0xef   :  { %3583 = vtanh.f32 %v276_v39 }
  0xf6   :  { %v3578_v36 = vpop.eup %3577 }
  0xf7   :  { %382 = vrot.lane.b32.xlu0 %v3578_v36, %s3725_s8  ;;  %v3580_v37 = vpop.eup %3579 }
  0xf8   :  { %v3582_v40 = vpop.eup %3581 }
  0xf9   :  { %v377_v41 = vmul.f32 0.5, %v3582_v40  ;;  %v3584_v42 = vpop.eup %3583 }
  0xfa   :  { %v278_v43 = vmul.f32 0.5, %v3584_v42 }
  0xfb   :  { %283 = vrot.lane.b32.xlu0 %v3580_v37, %s3725_s8  ;;  %v378_v44 = vadd.f32 0.5, %v377_v41 }
  0xfc   :  { %v279_v47 = vadd.f32 0.5, %v278_v43 }
  0xfd   :  { %v380_v50 = vmul.f32 0.0, %v378_v44 }
  0xfe   :  { %v281_v53 = vmul.f32 0.0, %v279_v47 }
 0x169   :  { %v383_v45 = vpop.permute.xlu0 %382 }
 0x16a   :  { %v385_v46 = vmul.f32 %v383_v45, %v378_v44 }
 0x16c   :  { %387 = vrot.lane.b32.xlu1 %v385_v46, %s3726_s9 }
 0x16d   :  { %v284_v48 = vpop.permute.xlu0 %283 }
 0x16e   :  { %v286_v49 = vmul.f32 %v284_v48, %v279_v47 }
 0x170   :  { %288 = vrot.lane.b32.xlu1 %v286_v49, %s3726_s9 }
 0x1de   :  { %v388_v51 = vpop.permute.xlu1 %387 }
 0x1df   :  { %v3856_v52 = vadd.f32 %v388_v51, %v380_v50 }
 0x1e1   :  { %3585 = vtanh.f32 %v3856_v52  ;;  %v595_v33 = vrot.slane %v3856_v52, 3 }
 0x1e2   :  { %v289_v54 = vpop.permute.xlu1 %288 }
 0x1e3   :  { %v3859_v55 = vadd.f32 %v289_v54, %v281_v53 }
 0x1e5   :  { %3587 = vtanh.f32 %v3859_v55  ;;  %v491_v35 = vrot.slane %v3859_v55, 5 }
 0x1eb   :  { %v3586_v56 = vpop.eup %3585 }
 0x1ec   :  { %393 = vrot.lane.b32.xlu0 %v3586_v56, %s3726_s9 }
 0x1ef   :  { %v3588_v57 = vpop.eup %3587 }
 0x1f0   :  { %294 = vrot.lane.b32.xlu1 %v3588_v57, %s3726_s9 }
 0x25e   :  { %v394_v58 = vpop.permute.xlu0 %393 }
 0x25f   :  { %v3864_v59 = vmul.f32 %v394_v58, %v378_v44 }
 0x261   :  { %v510_v60 = vrot.slane %v3864_v59, 4 }
 0x262   :  { %v295_v61 = vpop.permute.xlu1 %294 }
 0x263   :  { %v297_v62 = vmul.f32 %v295_v61, %v279_v47  ;;  %511 = vrot.lane.b32.xlu0 %v510_v60, %s3727_s10 }
 0x265   :  { %398 = vrot.lane.b32.xlu1 %v297_v62, %s3727_s10 }
 0x2d5   :  { %v512_v63 = vpop.permute.xlu0 %511 }
 0x2d6   :  { %3268 = vmatmul.mubr.msk.f32.vlgmr.msra.gmra.mrb[6].mxu1 %vm197_vm6, %v512_v63 }
 0x2d7   :  { %v399_v0 = vpop.permute.xlu1 %398  ;;  %3497 = vmatpush3.bf16.msra.mxu1 %v3803_v17  ;;  %3285 = vmatprep.mubr.msk.f32.mxu1 %vm3723_vm4, %v3724_v15 }
 0x2d8   :  { %402 = vst.msk [vmem:[#allocation2] sm:$0x7] %vm401_vm7, %v399_v0  ;;  %3259 = vmatmul.mubr.msk.f32.vlgmr.msra.gmra.mrb[2].mxu0 %vm197_vm6, %v399_v0  ;;  %3283 = vmatprep.subr.mxu1 %v3724_v15 }
 0x2d9   :  { %3494 = vmatpush3.bf16.msra.mxu0 %v3778_v11  ;;  %3276 = vmatprep.mubr.msk.f32.mxu0 %vm3723_vm4, %v3724_v15 }
 0x2da   :  { %3274 = vmatprep.subr.mxu0 %v3724_v15 }
 0x2db   :  { %3284 = vmatpush3.msk.msra.mxu1 %vm201_vm5, %v3820_v18 }
 0x2dc   :  { %3501 = vmatprep.subr.bf16.mxu1 %v3722_v12 }
 0x2dd   :  { %3275 = vmatpush3.msk.msra.mxu0 %vm201_vm5, %v3801_v16 }
 0x2de   :  { %3498 = vmatprep.subr.bf16.mxu0 %v3722_v12 }
 0x3a9   :  { %v581_v1 = vpop.f32.mrb[6].mxu1 }
 0x3aa   :  { %v586_v2 = vrot.slane %v581_v1, 7  ;;  %v3269_v3 = vpop.f32.mrb[7].mxu1 }
 0x3ab   :  { %v477_v4 = vpop.f32.mrb[2].mxu0 }
 0x3ac   :  { %v588_v5 = vadd.f32 %v586_v2, %v3846_v30  ;;  %v482_v6 = vrot.slane %v477_v4, 5  ;;  %v3260_v7 = vpop.f32.mrb[3].mxu0 }
 0x3ae   :  { %3589 = vtanh.f32 %v588_v5  ;;  %v484_v8 = vadd.f32 %v482_v6, %v3848_v31  ;;  %v589_v13 = vmul.f32 0.5, %v588_v5 }
 0x3b0   :  { %3591 = vtanh.f32 %v484_v8  ;;  %v485_v14 = vmul.f32 0.5, %v484_v8 }
 0x3b1   :  { %3593 = vtanh.f32 %v589_v13 }
 0x3b2   :  { %3595 = vtanh.f32 %v485_v14 }
 0x3b8   :  { %v3590_v9 = vpop.eup %3589 }
 0x3b9   :  { %599 = vrot.lane.b32.xlu0 %v3590_v9, %s3725_s8 }
 0x3ba   :  { %v3592_v10 = vpop.eup %3591 }
 0x3bb   :  { %495 = vrot.lane.b32.xlu1 %v3592_v10, %s3725_s8  ;;  %v3594_v19 = vpop.eup %3593 }
 0x3bc   :  { %v3596_v20 = vpop.eup %3595  ;;  %v591_v21 = vmul.f32 0.5, %v3594_v19 }
 0x3bd   :  { %v487_v23 = vmul.f32 0.5, %v3596_v20 }
 0x3be   :  { %v592_v24 = vadd.f32 0.5, %v591_v21 }
 0x3bf   :  { %v488_v28 = vadd.f32 0.5, %v487_v23 }
 0x3c0   :  { %v597_v34 = vmul.f32 %v595_v33, %v592_v24 }
 0x3c1   :  { %v493_v38 = vmul.f32 %v491_v35, %v488_v28 }
 0x42b   :  { %v600_v26 = vpop.permute.xlu0 %599 }
 0x42c   :  { %v602_v27 = vmul.f32 %v600_v26, %v592_v24 }
 0x42d   :  { %v496_v29 = vpop.permute.xlu1 %495 }
 0x42e   :  { %604 = vrot.lane.b32.xlu0 %v602_v27, %s3726_s9  ;;  %v498_v32 = vmul.f32 %v496_v29, %v488_v28 }
 0x430   :  { %500 = vrot.lane.b32.xlu1 %v498_v32, %s3726_s9 }
 0x4a0   :  { %v605_v36 = vpop.permute.xlu0 %604 }
 0x4a1   :  { %v3894_v37 = vadd.f32 %v605_v36, %v597_v34 }
 0x4a2   :  { %v501_v39 = vpop.permute.xlu1 %500 }
 0x4a3   :  { %3597 = vtanh.f32 %v3894_v37  ;;  %v3897_v40 = vadd.f32 %v501_v39, %v493_v38  ;;  %v844_v34 = vrot.slane %v3894_v37, 3 }
 0x4a5   :  { %3599 = vtanh.f32 %v3897_v40  ;;  %v717_v39 = vrot.slane %v3897_v40, 5 }
 0x4ad   :  { %v3598_v41 = vpop.eup %3597 }
 0x4ae   :  { %610 = vrot.lane.b32.xlu0 %v3598_v41, %s3726_s9 }
 0x4af   :  { %v3600_v42 = vpop.eup %3599 }
 0x4b0   :  { %506 = vrot.lane.b32.xlu1 %v3600_v42, %s3726_s9 }
 0x520   :  { %v611_v43 = vpop.permute.xlu0 %610 }
 0x521   :  { %v3902_v44 = vmul.f32 %v611_v43, %v592_v24 }
 0x522   :  { %v507_v46 = vpop.permute.xlu1 %506 }
 0x523   :  { %v753_v45 = vrot.slane %v3902_v44, 1  ;;  %v3905_v47 = vmul.f32 %v507_v46, %v488_v28 }
 0x525   :  { %754 = vrot.lane.b32.xlu0 %v753_v45, %s3727_s10  ;;  %v626_v48 = vrot.slane %v3905_v47, 3 }
 0x527   :  { %627 = vrot.lane.b32.xlu1 %v626_v48, %s3727_s10 }
 0x597   :  { %v755_v49 = vpop.permute.xlu0 %754 }
 0x598   :  { %3286 = vmatmul.mubr.msk.f32.vlgmr.msra.gmra.mrb[8].mxu1 %vm197_vm6, %v755_v49 }
 0x599   :  { %3503 = vmatpush3.bf16.msra.mxu1 %v3803_v17  ;;  %3303 = vmatprep.mubr.msk.f32.mxu1 %vm3723_vm4, %v3724_v15  ;;  %v628_v50 = vpop.permute.xlu1 %627 }
 0x59a   :  { %3301 = vmatprep.subr.mxu1 %v3724_v15  ;;  %3277 = vmatmul.mubr.msk.f32.vlgmr.msra.gmra.mrb[4].mxu0 %vm197_vm6, %v628_v50 }
 0x59b   :  { %3500 = vmatpush3.bf16.msra.mxu0 %v3778_v11  ;;  %3294 = vmatprep.mubr.msk.f32.mxu0 %vm3723_vm4, %v3724_v15 }
 0x59c   :  { %3292 = vmatprep.subr.mxu0 %v3724_v15 }
 0x59d   :  { %3302 = vmatpush3.msk.msra.mxu1 %vm201_vm5, %v3820_v18 }
 0x59e   :  { %3507 = vmatprep.subr.bf16.mxu1 %v3722_v12 }
 0x59f   :  { %3293 = vmatpush3.msk.msra.mxu0 %vm201_vm5, %v3801_v16 }
 0x5a0   :  { %3504 = vmatprep.subr.bf16.mxu0 %v3722_v12 }
 0x66b   :  { %v824_v51 = vpop.f32.mrb[8].mxu1 }
 0x66c   :  { %v829_v52 = vrot.slane %v824_v51, 2  ;;  %v3287_v53 = vpop.f32.mrb[9].mxu1 }
 0x66d   :  { %v697_v56 = vpop.f32.mrb[4].mxu0 }
 0x66e   :  { %v831_v54 = vadd.f32 %v829_v52, %v3839_v22  ;;  %v832_v55 = vadd.f32 %v829_v52, %v3846_v30  ;;  %v702_v57 = vrot.slane %v697_v56, 2  ;;  %v3278_v58 = vpop.f32.mrb[5].mxu0 }
 0x670   :  { %3601 = vtanh.f32 %v831_v54  ;;  %v704_v60 = vadd.f32 %v702_v57, %v3848_v31  ;;  %v705_v61 = vadd.f32 %v702_v57, %v3844_v25  ;;  %v833_v1 = vmul.f32 0.5, %v831_v54 }
 0x671   :  { %3603 = vtanh.f32 %v832_v55  ;;  %v834_v2 = vmul.f32 0.5, %v832_v55 }
 0x672   :  { %3605 = vtanh.f32 %v704_v60  ;;  %v706_v31 = vmul.f32 0.5, %v704_v60  ;;  %v707_v3 = vmul.f32 0.5, %v705_v61 }
 0x673   :  { %3607 = vtanh.f32 %v705_v61 }
 0x674   :  { %3609 = vtanh.f32 %v833_v1 }
 0x675   :  { %3611 = vtanh.f32 %v834_v2 }
 0x676   :  { %3613 = vtanh.f32 %v706_v31 }
 0x677   :  { %3615 = vtanh.f32 %v707_v3 }
 0x67a   :  { %v3602_v62 = vpop.eup %3601 }
 0x67b   :  { %v3604_v63 = vpop.eup %3603  ;;  %850 = vrot.lane.b32.xlu0 %v3602_v62, %s3725_s8 }
 0x67c   :  { %852 = vrot.lane.b32.xlu1 %v3604_v63, %s3725_s8  ;;  %v3606_v0 = vpop.eup %3605 }
 0x67d   :  { %v3608_v30 = vpop.eup %3607 }
 0x67e   :  { %v3610_v4 = vpop.eup %3609 }
 0x67f   :  { %723 = vrot.lane.b32.xlu0 %v3606_v0, %s3725_s8  ;;  %v3612_v5 = vpop.eup %3611  ;;  %v837_v6 = vmul.f32 0.5, %v3610_v4 }
 0x680   :  { %725 = vrot.lane.b32.xlu1 %v3608_v30, %s3725_s8  ;;  %v3614_v7 = vpop.eup %3613  ;;  %v838_v8 = vmul.f32 0.5, %v3612_v5 }
 0x681   :  { %v3616_v9 = vpop.eup %3615  ;;  %v839_v10 = vadd.f32 0.5, %v837_v6  ;;  %v710_v13 = vmul.f32 0.5, %v3614_v7 }
 0x682   :  { %v840_v19 = vadd.f32 0.5, %v838_v8  ;;  %v711_v24 = vmul.f32 0.5, %v3616_v9 }
 0x683   :  { %v712_v26 = vadd.f32 0.5, %v710_v13  ;;  %v846_v35 = vmul.f32 %v844_v34, %v839_v10 }
 0x684   :  { %v713_v29 = vadd.f32 0.5, %v711_v24  ;;  %v847_v36 = vmul.f32 %v844_v34, %v840_v19 }
 0x685   :  { %v719_v46 = vmul.f32 %v717_v39, %v712_v26 }
 0x686   :  { %v720_v51 = vmul.f32 %v717_v39, %v713_v29 }
 0x6ed   :  { %v851_v14 = vpop.permute.xlu0 %850 }
 0x6ee   :  { %v856_v20 = vmul.f32 %v851_v14, %v839_v10  ;;  %v853_v21 = vpop.permute.xlu1 %852 }
 0x6ef   :  { %v857_v23 = vmul.f32 %v853_v21, %v840_v19 }
 0x6f0   :  { %860 = vrot.lane.b32.xlu0 %v856_v20, %s3726_s9 }
 0x6f1   :  { %862 = vrot.lane.b32.xlu1 %v857_v23, %s3726_s9  ;;  %v724_v27 = vpop.permute.xlu0 %723 }
 0x6f2   :  { %v729_v28 = vmul.f32 %v724_v27, %v712_v26  ;;  %v726_v32 = vpop.permute.xlu1 %725 }
 0x6f3   :  { %v730_v33 = vmul.f32 %v726_v32, %v713_v29 }
 0x6f4   :  { %733 = vrot.lane.b32.xlu0 %v729_v28, %s3726_s9 }
 0x6f5   :  { %735 = vrot.lane.b32.xlu1 %v730_v33, %s3726_s9 }
 0x762   :  { %v861_v38 = vpop.permute.xlu0 %860 }
 0x763   :  { %v863_v41 = vpop.permute.xlu1 %862  ;;  %v866_v42 = vadd.f32 %v861_v38, %v846_v35 }
 0x764   :  { %v867_v43 = vadd.f32 %v863_v41, %v847_v36 }
 0x765   :  { %3617 = vtanh.f32 %v866_v42  ;;  %v1101_v45 = vrot.slane %v866_v42, 3 }
 0x766   :  { %3619 = vtanh.f32 %v867_v43  ;;  %v1102_v48 = vrot.slane %v867_v43, 3  ;;  %v734_v49 = vpop.permute.xlu0 %733 }
 0x767   :  { %v739_v50 = vadd.f32 %v734_v49, %v719_v46  ;;  %v736_v37 = vpop.permute.xlu1 %735 }
 0x768   :  { %v3941_v52 = vsel %vm1100_vm8, %v1101_v45, %v1102_v48  ;;  %v740_v53 = vadd.f32 %v736_v37, %v720_v51 }
 0x769   :  { %3621 = vtanh.f32 %v739_v50  ;;  %v991_v54 = vrot.slane %v739_v50, 5 }
 0x76a   :  { %3623 = vtanh.f32 %v740_v53  ;;  %v992_v40 = vrot.slane %v740_v53, 5 }
 0x76c   :  { %v3944_v55 = vsel %vm990_vm9, %v991_v54, %v992_v40 }
 0x76f   :  { %v3618_v56 = vpop.eup %3617 }
 0x770   :  { %v3620_v57 = vpop.eup %3619  ;;  %872 = vrot.lane.b32.xlu0 %v3618_v56, %s3726_s9 }
 0x771   :  { %874 = vrot.lane.b32.xlu1 %v3620_v57, %s3726_s9 }
 0x773   :  { %v3622_v58 = vpop.eup %3621 }
 0x774   :  { %745 = vrot.lane.b32.xlu0 %v3622_v58, %s3726_s9  ;;  %v3624_v60 = vpop.eup %3623 }
 0x775   :  { %747 = vrot.lane.b32.xlu1 %v3624_v60, %s3726_s9 }
 0x7e2   :  { %v873_v61 = vpop.permute.xlu0 %872 }
 0x7e3   :  { %v875_v62 = vpop.permute.xlu1 %874  ;;  %v3950_v63 = vmul.f32 %v873_v61, %v839_v10 }
 0x7e4   :  { %v3952_v0 = vmul.f32 %v875_v62, %v840_v19 }
 0x7e5   :  { %v1012_v30 = vrot.slane %v3950_v63, 6 }
 0x7e6   :  { %v1013_v1 = vrot.slane %v3952_v0, 6  ;;  %v746_v2 = vpop.permute.xlu0 %745 }
 0x7e7   :  { %v3956_v31 = vmul.f32 %v746_v2, %v712_v26  ;;  %v748_v4 = vpop.permute.xlu1 %747 }
 0x7e8   :  { %v1014_v3 = vsel %vm27_vm0, %v1012_v30, %v1013_v1  ;;  %v3960_v5 = vmul.f32 %v748_v4, %v713_v29 }
 0x7e9   :  { %1015 = vrot.lane.b32.xlu0 %v1014_v3, %s3727_s10  ;;  %v902_v6 = vrot.slane %v3956_v31, 6 }
 0x7ea   :  { %v903_v7 = vrot.slane %v3960_v5, 6 }
 0x7ec   :  { %v904_v8 = vsel %vm27_vm0, %v902_v6, %v903_v7 }
 0x7ed   :  { %905 = vrot.lane.b32.xlu1 %v904_v8, %s3727_s10 }
 0x85b   :  { %v1016_v9 = vpop.permute.xlu0 %1015 }
 0x85c   :  { %3304 = vmatmul.mubr.msk.f32.vlgmr.msra.gmra.mrb[10].mxu1 %vm197_vm6, %v1016_v9 }
 0x85d   :  { %3509 = vmatpush3.bf16.msra.mxu1 %v3803_v17  ;;  %3321 = vmatprep.mubr.msk.f32.mxu1 %vm3723_vm4, %v3724_v15 }
 0x85e   :  { %3319 = vmatprep.subr.mxu1 %v3724_v15 }
 0x85f   :  { %v906_v10 = vpop.permute.xlu1 %905 }
 0x860   :  { %3295 = vmatmul.mubr.msk.f32.vlgmr.msra.gmra.mrb[6].mxu0 %vm197_vm6, %v906_v10 }
 0x861   :  { %3320 = vmatpush3.msk.msra.mxu1 %vm201_vm5, %v3820_v18  ;;  %3506 = vmatpush3.bf16.msra.mxu0 %v3778_v11 }
 0x862   :  { %3312 = vmatprep.mubr.msk.f32.mxu0 %vm3723_vm4, %v3724_v15  ;;  %3310 = vmatprep.subr.mxu0 %v3724_v15 }
 0x865   :  { %3311 = vmatpush3.msk.msra.mxu0 %vm201_vm5, %v3801_v16 }
 0x92f   :  { %v1085_v17 = vpop.f32.mrb[10].mxu1 }
 0x930   :  { %v1090_v13 = vrot.slane %v1085_v17, 5  ;;  %v3305_v14 = vpop.f32.mrb[11].mxu1 }
 0x932   :  { %v1092_v19 = vadd.f32 %v1090_v13, %v3839_v22 }
 0x933   :  { %v975_v20 = vpop.f32.mrb[6].mxu0 }
 0x934   :  { %3625 = vtanh.f32 %v1092_v19  ;;  %v980_v18 = vrot.slane %v975_v20, 7  ;;  %v3296_v21 = vpop.f32.mrb[7].mxu0  ;;  %v1093_v26 = vmul.f32 0.5, %v1092_v19 }
 0x936   :  { %v982_v23 = vadd.f32 %v980_v18, %v3844_v25 }
 0x938   :  { %3627 = vtanh.f32 %v982_v23  ;;  %v983_v16 = vmul.f32 0.5, %v982_v23 }
 0x939   :  { %3629 = vtanh.f32 %v1093_v26 }
 0x93a   :  { %3631 = vtanh.f32 %v983_v16 }
 0x93e   :  { %v3626_v11 = vpop.eup %3625 }
 0x93f   :  { %1107 = vrot.lane.b32.xlu0 %v3626_v11, %s3725_s8 }
 0x942   :  { %v3628_v24 = vpop.eup %3627 }
 0x943   :  { %997 = vrot.lane.b32.xlu1 %v3628_v24, %s3725_s8  ;;  %v3630_v27 = vpop.eup %3629 }
 0x944   :  { %v1095_v28 = vmul.f32 0.5, %v3630_v27  ;;  %v3632_v29 = vpop.eup %3631 }
 0x945   :  { %v985_v35 = vmul.f32 0.5, %v3632_v29 }
 0x946   :  { %v1096_v32 = vadd.f32 0.5, %v1095_v28 }
 0x947   :  { %v986_v36 = vadd.f32 0.5, %v985_v35 }
 0x948   :  { %v1105_v41 = vmul.f32 %v3941_v52, %v1096_v32 }
 0x949   :  { %v995_v45 = vmul.f32 %v3944_v55, %v986_v36 }
 0x9b1   :  { %v1108_v33 = vpop.permute.xlu0 %1107 }
 0x9b2   :  { %v1110_v34 = vmul.f32 %v1108_v33, %v1096_v32  ;;  %v1356_v33 = vld [vmem:[%s4376_s1 + $0x78] sm:$0xf] }
 0x9b4   :  { %1112 = vrot.lane.b32.xlu0 %v1110_v34, %s3726_s9 }
 0x9b5   :  { %v998_v38 = vpop.permute.xlu1 %997 }
 0x9b6   :  { %v1000_v39 = vmul.f32 %v998_v38, %v986_v36  ;;  %v1533_v38 = vld [vmem:[%s4376_s1 + $0x88] sm:$0xff] }
 0x9b8   :  { %1002 = vrot.lane.b32.xlu1 %v1000_v39, %s3726_s9  ;;  %v1351_v39 = vld [vmem:[%s4376_s1 + $0x50] sm:$0xff] }
 0xa26   :  { %v1113_v42 = vpop.permute.xlu0 %1112 }
 0xa27   :  { %v1115_v43 = vadd.f32 %v1113_v42, %v1105_v41  ;;  %v1352_v42 = vld [vmem:[%s4376_s1 + $0x58] sm:$0xff] }
 0xa29   :  { %3633 = vtanh.f32 %v1115_v43  ;;  %v1318_v20 = vrot.slane %v1115_v43, 3 }
 0xa2a   :  { %v1003_v46 = vpop.permute.xlu1 %1002 }
 0xa2b   :  { %v1005_v48 = vadd.f32 %v1003_v46, %v995_v45  ;;  %v3514_v45 = vpack.c.bf16 %v1352_v42, %v1351_v39 }
 0xa2d   :  { %3635 = vtanh.f32 %v1005_v48  ;;  %v1217_v11 = vrot.slane %v1005_v48, 5 }
 0xa33   :  { %v3634_v49 = vpop.eup %3633 }
 0xa34   :  { %1118 = vrot.lane.b32.xlu0 %v3634_v49, %s3726_s9 }
 0xa37   :  { %v3636_v50 = vpop.eup %3635 }
 0xa38   :  { %1008 = vrot.lane.b32.xlu1 %v3636_v50, %s3726_s9 }
 0xaa6   :  { %v1119_v51 = vpop.permute.xlu0 %1118 }
 0xaa7   :  { %v1121_v37 = vmul.f32 %v1119_v51, %v1096_v32  ;;  %v1537_v32 = vld [vmem:[%s4376_s1 + $0xa8] sm:$0xf] }
 0xaa9   :  { %v1236_v53 = vrot.slane %v1121_v37, 3 }
 0xaaa   :  { %v1009_v52 = vpop.permute.xlu1 %1008 }
 0xaab   :  { %1237 = vrot.lane.b32.xlu0 %v1236_v53, %s3727_s10  ;;  %v1011_v54 = vmul.f32 %v1009_v52, %v986_v36  ;;  %v1532_v36 = vld [vmem:[%s4376_s1 + $0x80] sm:$0xff] }
 0xaac   :  { %v3522_v41 = vpack.c.bf16 %v1533_v38, %v1532_v36 }
 0xaad   :  { %v1132_v40 = vrot.slane %v1011_v54, 1 }
 0xaaf   :  { %1133 = vrot.lane.b32.xlu1 %v1132_v40, %s3727_s10 }
 0xb1d   :  { %v1238_v55 = vpop.permute.xlu0 %1237 }
 0xb1e   :  { %3322 = vmatmul.mubr.msk.f32.vlgmr.msra.gmra.mrb[12].mxu1 %vm197_vm6, %v1238_v55 }
 0xb21   :  { %v1134_v56 = vpop.permute.xlu1 %1133 }
 0xb22   :  { %3313 = vmatmul.mubr.msk.f32.vlgmr.msra.gmra.mrb[8].mxu0 %vm197_vm6, %v1134_v56  ;;  %v1534_v56 = vld [vmem:[%s4376_s1 + $0x90] sm:$0xf] }
 0xbf1   :  { %v1307_v57 = vpop.f32.mrb[12].mxu1 }
 0xbf2   :  { %v1311_v58 = vadd.f32 %v1307_v57, %v3839_v22  ;;  %v3323_v60 = vpop.f32.mrb[13].mxu1  ;;  %v1353_v57 = vld [vmem:[%s4376_s1 + $0x60] sm:$0xf] }
 0xbf4   :  { %3637 = vtanh.f32 %v1311_v58  ;;  %v1312_v4 = vmul.f32 0.5, %v1311_v58 }
 0xbf5   :  { %v1203_v61 = vpop.f32.mrb[8].mxu0 }
 0xbf6   :  { %v1208_v62 = vrot.slane %v1203_v61, 4  ;;  %v3314_v30 = vpop.f32.mrb[9].mxu0  ;;  %v1701_v61 = vld [vmem:[%s4376_s1 + $0xb0] sm:$0xff] }
 0xbf7   :  { %v1704_v30 = vld [vmem:[%s4376_s1 + $0xc8] sm:$0xff] }
 0xbf8   :  { %v1210_v1 = vadd.f32 %v1208_v62, %v3844_v25  ;;  %v1702_v62 = vld [vmem:[%s4376_s1 + $0xb8] sm:$0xff] }
 0xbfa   :  { %3639 = vtanh.f32 %v1210_v1  ;;  %v1211_v6 = vmul.f32 0.5, %v1210_v1  ;;  %v1705_v1 = vld [vmem:[%s4376_s1 + $0xd0] sm:$0xff] }
 0xbfb   :  { %3641 = vtanh.f32 %v1312_v4 }
 0xbfc   :  { %3643 = vtanh.f32 %v1211_v6  ;;  %v4113_v6 = vld [vmem:[%s4376_s1 + $0xc0] sm:$0xf] }
 0xbfe   :  { %v3638_v2 = vpop.eup %3637 }
 0xbff   :  { %1322 = vrot.lane.b32.xlu0 %v3638_v2, %s3725_s8  ;;  %v4100_v2 = vpack.c.bf16 %v1702_v62, %v1701_v61 }
 0xc04   :  { %v3640_v3 = vpop.eup %3639 }
 0xc05   :  { %1221 = vrot.lane.b32.xlu1 %v3640_v3, %s3725_s8  ;;  %v3642_v7 = vpop.eup %3641  ;;  %v4102_v3 = vpack.c.bf16 %v1705_v1, %v1704_v30 }
 0xc06   :  { %v1314_v22 = vmul.f32 0.5, %v3642_v7  ;;  %v3644_v9 = vpop.eup %3643  ;;  %v4118_v7 = vld [vmem:[%s4376_s1 + $0xd8] sm:$0xf] }
 0xc07   :  { %v1213_v25 = vmul.f32 0.5, %v3644_v9 }
 0xc08   :  { %v1315_v8 = vadd.f32 0.5, %v1314_v22  ;;  %v3069_v22 = vld [vmem:[%s4376_s1 + $0xf0] ss:$0 sm:$0xff] }
 0xc09   :  { %v3999_v13 = vadd.f32 0.5, %v1213_v25 }
 0xc0a   :  { %v1320_v18 = vmul.f32 %v1318_v20, %v1315_v8 }
 0xc0b   :  { %v1219_v24 = vmul.f32 %v1217_v11, %v3999_v13 }
 0xc71   :  { %v1323_v10 = vpop.permute.xlu0 %1322 }
 0xc72   :  { %v1325_v17 = vmul.f32 %v1323_v10, %v1315_v8 }
 0xc74   :  { %1327 = vrot.lane.b32.xlu0 %v1325_v17, %s3726_s9 }
 0xc77   :  { %v1222_v14 = vpop.permute.xlu1 %1221 }
 0xc78   :  { %v1224_v19 = vmul.f32 %v1222_v14, %v3999_v13 }
 0xc7a   :  { %1226 = vrot.lane.b32.xlu1 %v1224_v19, %s3726_s9 }
 0xce6   :  { %v1328_v21 = vpop.permute.xlu0 %1327 }
 0xce7   :  { %v1330_v23 = vadd.f32 %v1328_v21, %v1320_v18 }
 0xce9   :  { %3645 = vtanh.f32 %v1330_v23 }
 0xcec   :  { %v1227_v26 = vpop.permute.xlu1 %1226 }
 0xced   :  { %v1229_v16 = vadd.f32 %v1227_v26, %v1219_v24 }
 0xcef   :  { %3647 = vtanh.f32 %v1229_v16 }
 0xcf3   :  { %v3646_v27 = vpop.eup %3645 }
 0xcf4   :  { %1333 = vrot.lane.b32.xlu0 %v3646_v27, %s3726_s9 }
 0xcf8   :  { %894 = vrot.lane.b32.xlu0 %v3950_v63, %s3727_s10  ;;  %v1354_v63 = vld [vmem:[%s4376_s1 + $0x68] sm:$0xff] }
 0xcf9   :  { %v3648_v28 = vpop.eup %3647 }
 0xcfa   :  { %1232 = vrot.lane.b32.xlu1 %v3648_v28, %s3726_s9 }
 0xcfc   :  { %621 = vrot.lane.b32.xlu0 %v3902_v44, %s3727_s10  ;;  %v1355_v44 = vld [vmem:[%s4376_s1 + $0x70] sm:$0xff] }
 0xcfd   :  { %v3510_v29 = vpack.c.bf16 %v1355_v44, %v1354_v63 }
 0xcfe   :  { %1128 = vrot.lane.b32.xlu1 %v1121_v37, %s3727_s10 }
 0xcff   :  { %3511 = vmatprep.subr.bf16.mxu0 %v3510_v29 }
 0xd00   :  { %3513 = vmatpush3.bf16.msra.mxu0 %v3510_v29 }
 0xd01   :  { %3328 = vmatprep.subr.msk.mxu0 %vm201_vm5, %v1356_v33 }
 0xd02   :  { %404 = vrot.lane.b32.xlu1 %v3864_v59, %s3727_s10  ;;  %v1535_v59 = vld [vmem:[%s4376_s1 + $0x98] sm:$0xff] }
 0xd04   :  { %3329 = vmatpush3.msk.msra.mxu0 %vm201_vm5, %v1356_v33 }
 0xd05   :  { %3515 = vmatprep.subr.bf16.mxu0 %v3514_v45 }
 0xd06   :  { %896 = vrot.lane.b32.xlu1 %v3952_v0, %s3727_s10  ;;  %v1536_v0 = vld [vmem:[%s4376_s1 + $0xa0] sm:$0xff] }
 0xd0a   :  { %882 = vrot.lane.b32.xlu1 %v3956_v31, %s3727_s10  ;;  %v3518_v31 = vpack.c.bf16 %v1536_v0, %v1535_v59 }
 0xd0c   :  { %3519 = vmatprep.subr.bf16.mxu1 %v3518_v31 }
 0xd0d   :  { %3521 = vmatpush3.bf16.msra.mxu1 %v3518_v31 }
 0xd0e   :  { %1123 = vrot.lane.b32.xlu1 %v1011_v54, %s3727_s10  ;;  %3346 = vmatprep.subr.msk.mxu1 %vm201_vm5, %v1537_v32 }
 0xd11   :  { %3347 = vmatpush3.msk.msra.mxu1 %vm201_vm5, %v1537_v32 }
 0xd12   :  { %3523 = vmatprep.subr.bf16.mxu1 %v3522_v41 }
 0xd66   :  { %v1334_v34 = vpop.permute.xlu0 %1333 }
 0xd67   :  { %v1336_v35 = vmul.f32 %v1334_v34, %v1315_v8  ;;  %v3076_v8 = vld [vmem:[%s4376_s1 + $0xf8] ss:$0 sm:$0xff] }
 0xd69   :  { %1343 = vrot.lane.b32.xlu0 %v1336_v35, %s3727_s10 }
 0xd6a   :  { %v895_v43 = vpop.permute.xlu0 %894 }
 0xd6b   :  { %900 = vst.msk [vmem:[#allocation3] sm:$0xc0] %vm888_vm10, %v895_v43 }
 0xd6c   :  { %v1233_v46 = vpop.permute.xlu1 %1232 }
 0xd6d   :  { %615 = vrot.lane.b32.xlu0 %v3905_v47, %s3727_s10  ;;  %v1235_v50 = vmul.f32 %v1233_v46, %v3999_v13 }
 0xd6e   :  { %v622_v48 = vpop.permute.xlu0 %621 }
 0xd6f   :  { %625 = vst.msk [vmem:[#allocation3 + $0x8] sm:$0xe] %vm624_vm11, %v622_v48 }
 0xd70   :  { %v1129_v49 = vpop.permute.xlu1 %1128 }
 0xd71   :  { %884 = vrot.lane.b32.xlu0 %v3960_v5, %s3727_s10  ;;  %1131 = vst.msk [vmem:[#allocation3] sm:$0x38] %vm618_vm12, %v1129_v49 }
 0xd74   :  { %v405_v51 = vpop.permute.xlu1 %404 }
 0xd75   :  { %1338 = vrot.lane.b32.xlu0 %v1235_v50, %s3727_s10  ;;  %408 = vst.msk [vmem:[#allocation3 + $0x8] sm:$0x70] %vm407_vm13, %v405_v51 }
 0xd78   :  { %v897_v47 = vpop.permute.xlu1 %896 }
 0xd79   :  { %901 = vst.msk [vmem:[#allocation3 + $0x8] sm:$0x1] %vm890_vm14, %v897_v47 }
 0xd7c   :  { %v883_v37 = vpop.permute.xlu1 %882 }
 0xd7d   :  { %889 = vst.msk [vmem:[#allocation2] sm:$0xc0] %vm888_vm10, %v883_v37 }
 0xd80   :  { %v1124_v53 = vpop.permute.xlu1 %1123  ;;  %v1350_v55 = vld [vmem:[#allocation3 + $0x8] sm:$0x7f] }
 0xd81   :  { %1126 = vst.msk [vmem:[#allocation2 + $0x8] sm:$0xe] %vm624_vm11, %v1124_v53 }
 0xddb   :  { %v1344_v5 = vpop.permute.xlu0 %1343 }
 0xddc   :  { %1346 = vst.msk [vmem:[#allocation3] sm:$0x7] %vm401_vm7, %v1344_v5 }
 0xddf   :  { %v616_v52 = vpop.permute.xlu0 %615 }
 0xde0   :  { %619 = vst.msk [vmem:[#allocation2] sm:$0x38] %vm618_vm12, %v616_v52 }
 0xde3   :  { %v885_v54 = vpop.permute.xlu0 %884  ;;  %v1349_v40 = vld [vmem:[#allocation3] sm:$0xff] }
 0xde4   :  { %891 = vst.msk [vmem:[#allocation2 + $0x8] sm:$0x1] %vm890_vm14, %v885_v54  ;;  %3330 = vmatprep.mubr.msk.f32.mxu0 %vm197_vm6, %v1349_v40  ;;  %3348 = vmatprep.mubr.msk.f32.mxu1 %vm197_vm6, %v1349_v40 }
 0xde5   :  { %3331 = vmatmul.mubr.msk.f32.vlgmr.msra.gmra.mrb[10].mxu0 %vm197_vm6, %v1350_v55  ;;  %3349 = vmatmul.mubr.msk.f32.vlgmr.msra.gmra.mrb[14].mxu1 %vm197_vm6, %v1350_v55 }
 0xde6   :  { %3525 = vmatpush3.bf16.msra.mxu1 %v3522_v41  ;;  %3517 = vmatpush3.bf16.msra.mxu0 %v3514_v45 }
 0xde7   :  { %v1339_v58 = vpop.permute.xlu0 %1338  ;;  %v1347_v60 = vld [vmem:[#allocation2] sm:$0xff]  ;;  %3355 = vmatprep.subr.msk.mxu1 %vm201_vm5, %v1534_v56  ;;  %3337 = vmatprep.subr.msk.mxu0 %vm201_vm5, %v1353_v57 }
 0xde8   :  { %1341 = vst.msk [vmem:[#allocation2 + $0x8] sm:$0x70] %vm407_vm13, %v1339_v58  ;;  %3339 = vmatprep.mubr.msk.f32.mxu0 %vm197_vm6, %v1347_v60  ;;  %3357 = vmatprep.mubr.msk.f32.mxu1 %vm197_vm6, %v1347_v60 }
 0xdea   :  { %3356 = vmatpush3.msk.msra.mxu1 %vm201_vm5, %v1534_v56  ;;  %3338 = vmatpush3.msk.msra.mxu0 %vm201_vm5, %v1353_v57 }
 0xdeb   :  { %3526 = vmatprep.subr.bf16.mxu0 %v3722_v12  ;;  %3529 = vmatprep.subr.bf16.mxu1 %v3722_v12 }
 0xdef   :  { %v1348_v4 = vld [vmem:[#allocation2 + $0x8] sm:$0x7f] }
 0xdf0   :  { %3340 = vmatmul.mubr.msk.f32.vlgmr.msra.gmra.mrb[10].mxu0 %vm197_vm6, %v1348_v4  ;;  %3358 = vmatmul.mubr.msk.f32.vlgmr.msra.gmra.mrb[14].mxu1 %vm197_vm6, %v1348_v4 }
 0xdf1   :  { %3528 = vmatpush3.bf16.msra.mxu0 %v4100_v2  ;;  %3531 = vmatpush3.bf16.msra.mxu1 %v4102_v3 }
 0xdf2   :  { %3364 = vmatprep.subr.mxu0 %v3724_v15  ;;  %3373 = vmatprep.subr.mxu1 %v3724_v15 }
 0xdf3   :  { %3366 = vmatprep.mubr.msk.f32.mxu0 %vm3723_vm4, %v3724_v15  ;;  %3375 = vmatprep.mubr.msk.f32.mxu1 %vm3723_vm4, %v3724_v15 }
 0xdf5   :  { %3365 = vmatpush3.msk.msra.mxu0 %vm201_vm5, %v4113_v6  ;;  %3374 = vmatpush3.msk.msra.mxu1 %vm201_vm5, %v4118_v7 }
 0xdf6   :  { %3367 = vmatmul.mubr.f32.vlgmr.msra.gmra.mrb[12].mxu0 %v3724_v15  ;;  %3376 = vmatmul.mubr.f32.vlgmr.msra.gmra.mrb[16].mxu1 %v3724_v15 }
 0xdf7   :  { %3532 = vmatprep.subr.bf16.mxu0 %v3722_v12  ;;  %3535 = vmatprep.subr.bf16.mxu1 %v3722_v12 }
 0xdf8   :  { %3534 = vmatpush3.bf16.msra.mxu0 %v4100_v2  ;;  %3384 = vmatprep.mubr.msk.f32.mxu0 %vm3723_vm4, %v3724_v15 }
 0xdf9   :  { %3382 = vmatprep.subr.mxu0 %v3724_v15  ;;  %3537 = vmatpush3.bf16.msra.mxu1 %v4102_v3 }
 0xdfa   :  { %3391 = vmatprep.subr.mxu1 %v3724_v15  ;;  %3393 = vmatprep.mubr.msk.f32.mxu1 %vm3723_vm4, %v3724_v15 }
 0xdfc   :  { %3383 = vmatpush3.msk.msra.mxu0 %vm201_vm5, %v4113_v6 }
 0xdfd   :  { %3392 = vmatpush3.msk.msra.mxu1 %vm201_vm5, %v4118_v7  ;;  %3538 = vmatprep.subr.bf16.mxu0 %v3722_v12 }
 0xdfe   :  { %3541 = vmatprep.subr.bf16.mxu1 %v3722_v12 }
 0xec3   :  { %v3341_v9 = vpop.f32.mrb[10].mxu0  ;;  %v3359_v10 = vpop.f32.mrb[14].mxu1 }
 0xec4   :  { %v4152_v17 = vadd.f32 %v3341_v9, %v3069_v22  ;;  %v1517_v25 = vpop.f32.mrb[11].mxu0  ;;  %v1686_v13 = vpop.f32.mrb[15].mxu1  ;;  %v4158_v21 = vadd.f32 %v3359_v10, %v3076_v8 }
 0xec5   :  { %v4154_v14 = vadd.f32 %v3076_v8, %v1686_v13  ;;  %v4156_v19 = vadd.f32 %v3069_v22, %v1517_v25 }
 0xec9   :  { %v1776_v20 = vpop.f32.mrb[12].mxu0  ;;  %v1872_v18 = vpop.f32.mrb[16].mxu1 }
 0xeca   :  { %v1780_v23 = vadd.f32 %v1776_v20, %v4156_v19  ;;  %v1877_v11 = vrot.slane %v1872_v18, 4  ;;  %v3377_v24 = vpop.f32.mrb[17].mxu1  ;;  %v3368_v26 = vpop.f32.mrb[13].mxu0 }
 0xecc   :  { %3649 = vtanh.f32 %v1780_v23  ;;  %v1879_v16 = vadd.f32 %v1877_v11, %v4158_v21  ;;  %v1781_v63 = vmul.f32 0.5, %v1780_v23 }
 0xece   :  { %3651 = vtanh.f32 %v1879_v16  ;;  %v1880_v44 = vmul.f32 0.5, %v1879_v16 }
 0xecf   :  { %3653 = vtanh.f32 %v1781_v63 }
 0xed0   :  { %3655 = vtanh.f32 %v1880_v44 }
 0xed6   :  { %v3650_v27 = vpop.eup %3649 }
 0xed7   :  { %1788 = vrot.lane.b32.xlu0 %v3650_v27, %s3725_s8 }
 0xed8   :  { %v3652_v28 = vpop.eup %3651 }
 0xed9   :  { %1887 = vrot.lane.b32.xlu1 %v3652_v28, %s3725_s8  ;;  %v3654_v59 = vpop.eup %3653 }
 0xeda   :  { %v3656_v29 = vpop.eup %3655  ;;  %v1783_v0 = vmul.f32 0.5, %v3654_v59 }
 0xedb   :  { %v1882_v31 = vmul.f32 0.5, %v3656_v29 }
 0xedc   :  { %v1784_v32 = vadd.f32 0.5, %v1783_v0 }
 0xedd   :  { %v1883_v35 = vadd.f32 0.5, %v1882_v31 }
 0xede   :  { %v1786_v39 = vmul.f32 0.0, %v1784_v32 }
 0xedf   :  { %v1885_v43 = vmul.f32 0.0, %v1883_v35 }
 0xf49   :  { %v1789_v33 = vpop.permute.xlu0 %1788 }
 0xf4a   :  { %v1791_v34 = vmul.f32 %v1789_v33, %v1784_v32 }
 0xf4b   :  { %v1888_v36 = vpop.permute.xlu1 %1887 }
 0xf4c   :  { %1793 = vrot.lane.b32.xlu0 %v1791_v34, %s3726_s9  ;;  %v1890_v38 = vmul.f32 %v1888_v36, %v1883_v35 }
 0xf4e   :  { %1892 = vrot.lane.b32.xlu1 %v1890_v38, %s3726_s9 }
 0xfbe   :  { %v1794_v41 = vpop.permute.xlu0 %1793 }
 0xfbf   :  { %v4166_v42 = vadd.f32 %v1794_v41, %v1786_v39 }
 0xfc0   :  { %v1893_v45 = vpop.permute.xlu1 %1892 }
 0xfc1   :  { %3657 = vtanh.f32 %v4166_v42  ;;  %v4169_v46 = vadd.f32 %v1893_v45, %v1885_v43  ;;  %v1994_v24 = vrot.slane %v4166_v42, 5 }
 0xfc3   :  { %3659 = vtanh.f32 %v4169_v46  ;;  %v2098_v28 = vrot.slane %v4169_v46, 3 }
 0xfcb   :  { %v3658_v48 = vpop.eup %3657 }
 0xfcc   :  { %1799 = vrot.lane.b32.xlu0 %v3658_v48, %s3726_s9 }
 0xfcd   :  { %v3660_v49 = vpop.eup %3659 }
 0xfce   :  { %1898 = vrot.lane.b32.xlu1 %v3660_v49, %s3726_s9 }
0x103e   :  { %v1800_v50 = vpop.permute.xlu0 %1799 }
0x103f   :  { %v1802_v51 = vmul.f32 %v1800_v50, %v1784_v32 }
0x1040   :  { %v1899_v47 = vpop.permute.xlu1 %1898 }
0x1041   :  { %1903 = vrot.lane.b32.xlu0 %v1802_v51, %s3727_s10  ;;  %v4175_v37 = vmul.f32 %v1899_v47, %v1883_v35 }
0x1043   :  { %v2013_v53 = vrot.slane %v4175_v37, 4 }
0x1045   :  { %2014 = vrot.lane.b32.xlu1 %v2013_v53, %s3727_s10 }
0x10b3   :  { %v1904_v5 = vpop.permute.xlu0 %1903 }
0x10b4   :  { %1906 = vst.msk [vmem:[#allocation4] sm:$0x7] %vm401_vm7, %v1904_v5  ;;  %3385 = vmatmul.mubr.msk.f32.vlgmr.msra.gmra.mrb[14].mxu0 %vm197_vm6, %v1904_v5 }
0x10b5   :  { %3540 = vmatpush3.bf16.msra.mxu0 %v4100_v2  ;;  %3402 = vmatprep.mubr.msk.f32.mxu0 %vm3723_vm4, %v3724_v15 }
0x10b6   :  { %3400 = vmatprep.subr.mxu0 %v3724_v15 }
0x10b7   :  { %v2015_v52 = vpop.permute.xlu1 %2014 }
0x10b8   :  { %3394 = vmatmul.mubr.msk.f32.vlgmr.msra.gmra.mrb[18].mxu1 %vm197_vm6, %v2015_v52 }
0x10b9   :  { %3401 = vmatpush3.msk.msra.mxu0 %vm201_vm5, %v4113_v6  ;;  %3543 = vmatpush3.bf16.msra.mxu1 %v4102_v3 }
0x10ba   :  { %3411 = vmatprep.mubr.msk.f32.mxu1 %vm3723_vm4, %v3724_v15  ;;  %3409 = vmatprep.subr.mxu1 %v3724_v15 }
0x10bb   :  { %3544 = vmatprep.subr.bf16.mxu0 %v3722_v12 }
0x10bd   :  { %3410 = vmatpush3.msk.msra.mxu1 %vm201_vm5, %v4118_v7 }
0x10be   :  { %3547 = vmatprep.subr.bf16.mxu1 %v3722_v12 }
0x1187   :  { %v1980_v54 = vpop.f32.mrb[14].mxu0 }
0x1188   :  { %v1985_v40 = vrot.slane %v1980_v54, 5  ;;  %v3386_v55 = vpop.f32.mrb[15].mxu0 }
0x118a   :  { %v1987_v56 = vadd.f32 %v1985_v40, %v4156_v19 }
0x118b   :  { %v2084_v57 = vpop.f32.mrb[18].mxu1 }
0x118c   :  { %3661 = vtanh.f32 %v1987_v56  ;;  %v2089_v58 = vrot.slane %v2084_v57, 7  ;;  %v3395_v60 = vpop.f32.mrb[19].mxu1  ;;  %v1988_v1 = vmul.f32 0.5, %v1987_v56 }
0x118e   :  { %v2091_v61 = vadd.f32 %v2089_v58, %v4158_v21 }
0x1190   :  { %3663 = vtanh.f32 %v2091_v61  ;;  %v2092_v4 = vmul.f32 0.5, %v2091_v61 }
0x1191   :  { %3665 = vtanh.f32 %v1988_v1 }
0x1192   :  { %3667 = vtanh.f32 %v2092_v4 }
0x1196   :  { %v3662_v62 = vpop.eup %3661 }
0x1197   :  { %1998 = vrot.lane.b32.xlu0 %v3662_v62, %s3725_s8 }
0x119a   :  { %v3664_v30 = vpop.eup %3663 }
0x119b   :  { %2102 = vrot.lane.b32.xlu1 %v3664_v30, %s3725_s8  ;;  %v3666_v22 = vpop.eup %3665 }
0x119c   :  { %v1990_v8 = vmul.f32 0.5, %v3666_v22  ;;  %v3668_v9 = vpop.eup %3667 }
0x119d   :  { %v2094_v13 = vmul.f32 0.5, %v3668_v9 }
0x119e   :  { %v1991_v10 = vadd.f32 0.5, %v1990_v8 }
0x119f   :  { %v2095_v18 = vadd.f32 0.5, %v2094_v13 }
0x11a0   :  { %v1996_v26 = vmul.f32 %v1994_v24, %v1991_v10 }
0x11a1   :  { %v2100_v63 = vmul.f32 %v2098_v28, %v2095_v18 }
0x1209   :  { %v1999_v25 = vpop.permute.xlu0 %1998 }
0x120a   :  { %v2001_v20 = vmul.f32 %v1999_v25, %v1991_v10 }
0x120c   :  { %2003 = vrot.lane.b32.xlu0 %v2001_v20, %s3726_s9 }
0x120d   :  { %v2103_v23 = vpop.permute.xlu1 %2102 }
0x120e   :  { %v2105_v11 = vmul.f32 %v2103_v23, %v2095_v18 }
0x1210   :  { %2107 = vrot.lane.b32.xlu1 %v2105_v11, %s3726_s9 }
0x127e   :  { %v2004_v16 = vpop.permute.xlu0 %2003 }
0x127f   :  { %v4203_v27 = vadd.f32 %v2004_v16, %v1996_v26 }
0x1281   :  { %3669 = vtanh.f32 %v4203_v27 }
0x1282   :  { %v2108_v44 = vpop.permute.xlu1 %2107 }
0x1283   :  { %v4207_v59 = vadd.f32 %v2108_v44, %v2100_v63  ;;  %v2218_v63 = vrot.slane %v4203_v27, 5 }
0x1285   :  { %3671 = vtanh.f32 %v4207_v59  ;;  %v2345_v24 = vrot.slane %v4207_v59, 3 }
0x128b   :  { %v3670_v29 = vpop.eup %3669 }
0x128c   :  { %2009 = vrot.lane.b32.xlu0 %v3670_v29, %s3726_s9 }
0x128f   :  { %v3672_v0 = vpop.eup %3671 }
0x1290   :  { %2113 = vrot.lane.b32.xlu1 %v3672_v0, %s3726_s9 }
0x12fe   :  { %v2010_v31 = vpop.permute.xlu0 %2009 }
0x12ff   :  { %v4212_v32 = vmul.f32 %v2010_v31, %v1991_v10 }
0x1301   :  { %v2127_v33 = vrot.slane %v4212_v32, 3 }
0x1302   :  { %v2114_v34 = vpop.permute.xlu1 %2113 }
0x1303   :  { %2128 = vrot.lane.b32.xlu0 %v2127_v33, %s3727_s10  ;;  %v4216_v35 = vmul.f32 %v2114_v34, %v2095_v18 }
0x1305   :  { %v2254_v36 = vrot.slane %v4216_v35, 1 }
0x1307   :  { %2255 = vrot.lane.b32.xlu1 %v2254_v36, %s3727_s10 }
0x1375   :  { %v2129_v38 = vpop.permute.xlu0 %2128 }
0x1376   :  { %3403 = vmatmul.mubr.msk.f32.vlgmr.msra.gmra.mrb[16].mxu0 %vm197_vm6, %v2129_v38 }
0x1377   :  { %3546 = vmatpush3.bf16.msra.mxu0 %v4100_v2  ;;  %3420 = vmatprep.mubr.msk.f32.mxu0 %vm3723_vm4, %v3724_v15 }
0x1378   :  { %3418 = vmatprep.subr.mxu0 %v3724_v15 }
0x1379   :  { %v2256_v39 = vpop.permute.xlu1 %2255 }
0x137a   :  { %3412 = vmatmul.mubr.msk.f32.vlgmr.msra.gmra.mrb[20].mxu1 %vm197_vm6, %v2256_v39 }
0x137b   :  { %3419 = vmatpush3.msk.msra.mxu0 %vm201_vm5, %v4113_v6  ;;  %3549 = vmatpush3.bf16.msra.mxu1 %v4102_v3 }
0x137c   :  { %3429 = vmatprep.mubr.msk.f32.mxu1 %vm3723_vm4, %v3724_v15  ;;  %3427 = vmatprep.subr.mxu1 %v3724_v15 }
0x137d   :  { %3550 = vmatprep.subr.bf16.mxu0 %v3722_v12 }
0x137f   :  { %3428 = vmatpush3.msk.msra.mxu1 %vm201_vm5, %v4118_v7 }
0x1380   :  { %3553 = vmatprep.subr.bf16.mxu1 %v3722_v12 }
0x1449   :  { %v2198_v41 = vpop.f32.mrb[16].mxu0 }
0x144a   :  { %v3404_v42 = vpop.f32.mrb[17].mxu0  ;;  %v2203_v45 = vrot.slane %v2198_v41, 2 }
0x144c   :  { %v2205_v51 = vadd.f32 %v2203_v45, %v4156_v19  ;;  %v2206_v47 = vadd.f32 %v2203_v45, %v4152_v17 }
0x144d   :  { %v2325_v43 = vpop.f32.mrb[20].mxu1 }
0x144e   :  { %v2330_v46 = vrot.slane %v2325_v43, 2  ;;  %v3413_v48 = vpop.f32.mrb[21].mxu1  ;;  %v2207_v54 = vmul.f32 0.5, %v2205_v51  ;;  %v2208_v40 = vmul.f32 0.5, %v2206_v47 }
0x1450   :  { %v2332_v49 = vadd.f32 %v2330_v46, %v4154_v14  ;;  %v2333_v50 = vadd.f32 %v2330_v46, %v4158_v21 }
0x1452   :  { %3673 = vtanh.f32 %v2332_v49  ;;  %v2334_v21 = vmul.f32 0.5, %v2332_v49  ;;  %v2335_v19 = vmul.f32 0.5, %v2333_v50 }
0x1453   :  { %3675 = vtanh.f32 %v2333_v50 }
0x1454   :  { %3677 = vtanh.f32 %v2205_v51 }
0x1455   :  { %3679 = vtanh.f32 %v2206_v47 }
0x1456   :  { %3681 = vtanh.f32 %v2334_v21 }
0x1457   :  { %3683 = vtanh.f32 %v2335_v19 }
0x1458   :  { %3685 = vtanh.f32 %v2207_v54 }
0x1459   :  { %3687 = vtanh.f32 %v2208_v40 }
0x145c   :  { %v3674_v53 = vpop.eup %3673 }
0x145d   :  { %v3676_v12 = vpop.eup %3675  ;;  %2351 = vrot.lane.b32.xlu1 %v3674_v53, %s3725_s8 }
0x145e   :  { %2353 = vrot.lane.b32.xlu0 %v3676_v12, %s3725_s8  ;;  %v3678_v5 = vpop.eup %3677 }
0x145f   :  { %v3680_v52 = vpop.eup %3679 }
0x1460   :  { %v3682_v55 = vpop.eup %3681 }
0x1461   :  { %2224 = vrot.lane.b32.xlu1 %v3678_v5, %s3725_s8  ;;  %v3684_v56 = vpop.eup %3683  ;;  %v2338_v57 = vmul.f32 0.5, %v3682_v55 }
0x1462   :  { %2226 = vrot.lane.b32.xlu0 %v3680_v52, %s3725_s8  ;;  %v3686_v58 = vpop.eup %3685  ;;  %v2339_v60 = vmul.f32 0.5, %v3684_v56 }
0x1463   :  { %v3688_v61 = vpop.eup %3687  ;;  %v2340_v62 = vadd.f32 0.5, %v2338_v57  ;;  %v2211_v30 = vmul.f32 0.5, %v3686_v58 }
0x1464   :  { %v2341_v4 = vadd.f32 0.5, %v2339_v60  ;;  %v2212_v22 = vmul.f32 0.5, %v3688_v61 }
0x1465   :  { %v2213_v25 = vadd.f32 0.5, %v2211_v30  ;;  %v2347_v26 = vmul.f32 %v2345_v24, %v2340_v62 }
0x1466   :  { %v2214_v13 = vadd.f32 0.5, %v2212_v22  ;;  %v2348_v16 = vmul.f32 %v2345_v24, %v2341_v4 }
0x1467   :  { %v2220_v33 = vmul.f32 %v2218_v63, %v2213_v25 }
0x1468   :  { %v2221_v36 = vmul.f32 %v2218_v63, %v2214_v13 }
0x14cf   :  { %v2352_v1 = vpop.permute.xlu1 %2351 }
0x14d0   :  { %v2357_v8 = vmul.f32 %v2352_v1, %v2340_v62  ;;  %v2354_v9 = vpop.permute.xlu0 %2353 }
0x14d1   :  { %v2358_v10 = vmul.f32 %v2354_v9, %v2341_v4 }
0x14d2   :  { %2361 = vrot.lane.b32.xlu1 %v2357_v8, %s3726_s9 }
0x14d3   :  { %2363 = vrot.lane.b32.xlu0 %v2358_v10, %s3726_s9  ;;  %v2225_v20 = vpop.permute.xlu1 %2224 }
0x14d4   :  { %v2227_v18 = vpop.permute.xlu0 %2226  ;;  %v2230_v23 = vmul.f32 %v2225_v20, %v2213_v25 }
0x14d5   :  { %v2231_v11 = vmul.f32 %v2227_v18, %v2214_v13 }
0x14d6   :  { %2234 = vrot.lane.b32.xlu1 %v2230_v23, %s3726_s9 }
0x14d7   :  { %2236 = vrot.lane.b32.xlu0 %v2231_v11, %s3726_s9 }
0x1544   :  { %v2362_v28 = vpop.permute.xlu1 %2361 }
0x1545   :  { %v2364_v44 = vpop.permute.xlu0 %2363  ;;  %v2367_v29 = vadd.f32 %v2362_v28, %v2347_v26 }
0x1546   :  { %v2368_v0 = vadd.f32 %v2364_v44, %v2348_v16 }
0x1547   :  { %3689 = vtanh.f32 %v2367_v29  ;;  %v2598_v31 = vrot.slane %v2367_v29, 3 }
0x1548   :  { %3691 = vtanh.f32 %v2368_v0  ;;  %v2599_v34 = vrot.slane %v2368_v0, 3  ;;  %v2235_v38 = vpop.permute.xlu1 %2234 }
0x1549   :  { %v2237_v39 = vpop.permute.xlu0 %2236  ;;  %v2240_v41 = vadd.f32 %v2235_v38, %v2220_v33 }
0x154a   :  { %v2241_v42 = vadd.f32 %v2237_v39, %v2221_v36  ;;  %v4251_v59 = vsel %vm1100_vm8, %v2598_v31, %v2599_v34 }
0x154b   :  { %3693 = vtanh.f32 %v2240_v41  ;;  %v2489_v43 = vrot.slane %v2240_v41, 5 }
0x154c   :  { %3695 = vtanh.f32 %v2241_v42  ;;  %v2490_v27 = vrot.slane %v2241_v42, 5 }
0x154e   :  { %v4254_v45 = vsel %vm990_vm9, %v2489_v43, %v2490_v27 }
0x1551   :  { %v3690_v46 = vpop.eup %3689 }
0x1552   :  { %v3692_v48 = vpop.eup %3691  ;;  %2373 = vrot.lane.b32.xlu1 %v3690_v46, %s3726_s9 }
0x1553   :  { %2375 = vrot.lane.b32.xlu0 %v3692_v48, %s3726_s9 }
0x1555   :  { %v3694_v49 = vpop.eup %3693 }
0x1556   :  { %v3696_v50 = vpop.eup %3695  ;;  %2246 = vrot.lane.b32.xlu1 %v3694_v49, %s3726_s9 }
0x1557   :  { %2248 = vrot.lane.b32.xlu0 %v3696_v50, %s3726_s9 }
0x15c4   :  { %v2374_v51 = vpop.permute.xlu1 %2373 }
0x15c5   :  { %v2376_v47 = vpop.permute.xlu0 %2375  ;;  %v4260_v53 = vmul.f32 %v2374_v51, %v2340_v62 }
0x15c6   :  { %v4262_v12 = vmul.f32 %v2376_v47, %v2341_v4 }
0x15c7   :  { %v2510_v5 = vrot.slane %v4260_v53, 6 }
0x15c8   :  { %v2511_v52 = vrot.slane %v4262_v12, 6  ;;  %v2247_v21 = vpop.permute.xlu1 %2246 }
0x15c9   :  { %v2249_v19 = vpop.permute.xlu0 %2248  ;;  %v4266_v54 = vmul.f32 %v2247_v21, %v2213_v25 }
0x15ca   :  { %v4268_v40 = vmul.f32 %v2249_v19, %v2214_v13  ;;  %v2512_v55 = vsel %vm27_vm0, %v2510_v5, %v2511_v52 }
0x15cb   :  { %v2401_v56 = vrot.slane %v4266_v54, 6  ;;  %2513 = vrot.lane.b32.xlu1 %v2512_v55, %s3727_s10 }
0x15cc   :  { %v2402_v57 = vrot.slane %v4268_v40, 6 }
0x15ce   :  { %v2403_v58 = vsel %vm27_vm0, %v2401_v56, %v2402_v57  ;;  %vm3029_vm0 = vcmask 31744  }
0x15cf   :  { %2404 = vrot.lane.b32.xlu0 %v2403_v58, %s3727_s10 }
0x163d   :  { %v2514_v60 = vpop.permute.xlu1 %2513 }
0x163e   :  { %3430 = vmatmul.mubr.msk.f32.vlgmr.msra.gmra.mrb[22].mxu1 %vm197_vm6, %v2514_v60 }
0x163f   :  { %3555 = vmatpush3.bf16.msra.mxu1 %v4102_v3  ;;  %3447 = vmatprep.mubr.msk.f32.mxu1 %vm3723_vm4, %v3724_v15 }
0x1640   :  { %3445 = vmatprep.subr.mxu1 %v3724_v15 }
0x1641   :  { %v2405_v61 = vpop.permute.xlu0 %2404 }
0x1642   :  { %3421 = vmatmul.mubr.msk.f32.vlgmr.msra.gmra.mrb[18].mxu0 %vm197_vm6, %v2405_v61 }
0x1643   :  { %3552 = vmatpush3.bf16.msra.mxu0 %v4100_v2  ;;  %3446 = vmatpush3.msk.msra.mxu1 %vm201_vm5, %v4118_v7 }
0x1644   :  { %3436 = vmatprep.subr.mxu0 %v3724_v15  ;;  %3438 = vmatprep.mubr.msk.f32.mxu0 %vm3723_vm4, %v3724_v15 }
0x1647   :  { %3437 = vmatpush3.msk.msra.mxu0 %vm201_vm5, %v4113_v6 }
0x1711   :  { %v2583_v3 = vpop.f32.mrb[22].mxu1 }
0x1712   :  { %v2588_v62 = vrot.slane %v2583_v3, 5  ;;  %v3431_v30 = vpop.f32.mrb[23].mxu1 }
0x1714   :  { %v2590_v1 = vadd.f32 %v2588_v62, %v4154_v14 }
0x1715   :  { %v2474_v4 = vpop.f32.mrb[18].mxu0 }
0x1716   :  { %3697 = vtanh.f32 %v2590_v1  ;;  %v2479_v22 = vrot.slane %v2474_v4, 7  ;;  %v3422_v2 = vpop.f32.mrb[19].mxu0  ;;  %v2591_v15 = vmul.f32 0.5, %v2590_v1 }
0x1718   :  { %v2481_v8 = vadd.f32 %v2479_v22, %v4152_v17 }
0x171a   :  { %3699 = vtanh.f32 %v2481_v8  ;;  %v2482_v6 = vmul.f32 0.5, %v2481_v8 }
0x171b   :  { %3701 = vtanh.f32 %v2591_v15 }
0x171c   :  { %3703 = vtanh.f32 %v2482_v6 }
0x1720   :  { %v3698_v7 = vpop.eup %3697 }
0x1721   :  { %2604 = vrot.lane.b32.xlu1 %v3698_v7, %s3725_s8 }
0x1724   :  { %v3700_v9 = vpop.eup %3699 }
0x1725   :  { %2495 = vrot.lane.b32.xlu0 %v3700_v9, %s3725_s8  ;;  %v3702_v10 = vpop.eup %3701 }
0x1726   :  { %v2593_v25 = vmul.f32 0.5, %v3702_v10  ;;  %v3704_v13 = vpop.eup %3703 }
0x1727   :  { %v2484_v18 = vmul.f32 0.5, %v3704_v13  ;;  %v2849_v13 = vld [vmem:[%s4376_s1 + $0x108] sm:$0xff] }
0x1728   :  { %v2594_v20 = vadd.f32 0.5, %v2593_v25  ;;  %v2848_v25 = vld [vmem:[%s4376_s1 + $0x100] sm:$0xff] }
0x1729   :  { %v2485_v24 = vadd.f32 0.5, %v2484_v18 }
0x172a   :  { %v2602_v28 = vmul.f32 %v4251_v59, %v2594_v20 }
0x172b   :  { %v2493_v29 = vmul.f32 %v4254_v45, %v2485_v24 }
0x1793   :  { %v2605_v23 = vpop.permute.xlu1 %2604 }
0x1794   :  { %v2607_v11 = vmul.f32 %v2605_v23, %v2594_v20 }
0x1796   :  { %2609 = vrot.lane.b32.xlu1 %v2607_v11, %s3726_s9 }
0x1797   :  { %v2496_v26 = vpop.permute.xlu0 %2495 }
0x1798   :  { %v2498_v16 = vmul.f32 %v2496_v26, %v2485_v24 }
0x179a   :  { %2500 = vrot.lane.b32.xlu0 %v2498_v16, %s3726_s9 }
0x1808   :  { %v2610_v63 = vpop.permute.xlu1 %2609 }
0x1809   :  { %v2612_v44 = vadd.f32 %v2610_v63, %v2602_v28 }
0x180b   :  { %3705 = vtanh.f32 %v2612_v44  ;;  %v2815_v30 = vrot.slane %v2612_v44, 3 }
0x180c   :  { %v2501_v0 = vpop.permute.xlu0 %2500 }
0x180d   :  { %v2503_v31 = vadd.f32 %v2501_v0, %v2493_v29 }
0x180f   :  { %3707 = vtanh.f32 %v2503_v31  ;;  %v2714_v2 = vrot.slane %v2503_v31, 5 }
0x1815   :  { %v3706_v33 = vpop.eup %3705 }
0x1816   :  { %2615 = vrot.lane.b32.xlu1 %v3706_v33, %s3726_s9  ;;  %v2850_v33 = vld [vmem:[%s4376_s1 + $0x110] sm:$0xf] }
0x1819   :  { %v3708_v34 = vpop.eup %3707 }
0x181a   :  { %2506 = vrot.lane.b32.xlu0 %v3708_v34, %s3726_s9 }
0x1888   :  { %v2616_v36 = vpop.permute.xlu1 %2615 }
0x1889   :  { %v2618_v38 = vmul.f32 %v2616_v36, %v2594_v20  ;;  %v3560_v20 = vpack.c.bf16 %v2849_v13, %v2848_v25 }
0x188b   :  { %v2733_v39 = vrot.slane %v2618_v38, 3 }
0x188c   :  { %v2507_v41 = vpop.permute.xlu0 %2506 }
0x188d   :  { %v2509_v42 = vmul.f32 %v2507_v41, %v2485_v24  ;;  %2734 = vrot.lane.b32.xlu1 %v2733_v39, %s3727_s10  ;;  %v3101_v39 = vld [vmem:[%s4376_s1 + $0x130] ss:$0 sm:$0xff] }
0x188f   :  { %v2629_v59 = vrot.slane %v2509_v42, 1 }
0x1891   :  { %2630 = vrot.lane.b32.xlu0 %v2629_v59, %s3727_s10 }
0x18ff   :  { %v2735_v43 = vpop.permute.xlu1 %2734 }
0x1900   :  { %3448 = vmatmul.mubr.msk.f32.vlgmr.msra.gmra.mrb[24].mxu1 %vm197_vm6, %v2735_v43 }
0x1903   :  { %v2631_v27 = vpop.permute.xlu0 %2630 }
0x1904   :  { %3439 = vmatmul.mubr.msk.f32.vlgmr.msra.gmra.mrb[20].mxu0 %vm197_vm6, %v2631_v27 }
0x19d3   :  { %v2804_v45 = vpop.f32.mrb[24].mxu1 }
0x19d4   :  { %v2808_v46 = vadd.f32 %v2804_v45, %v4154_v14  ;;  %v3449_v48 = vpop.f32.mrb[25].mxu1 }
0x19d6   :  { %3709 = vtanh.f32 %v2808_v46  ;;  %v2809_v21 = vmul.f32 0.5, %v2808_v46 }
0x19d7   :  { %v2700_v49 = vpop.f32.mrb[20].mxu0 }
0x19d8   :  { %v2705_v50 = vrot.slane %v2700_v49, 4  ;;  %v3440_v51 = vpop.f32.mrb[21].mxu0 }
0x19da   :  { %v2707_v47 = vadd.f32 %v2705_v50, %v4152_v17 }
0x19dc   :  { %3711 = vtanh.f32 %v2707_v47  ;;  %v2708_v19 = vmul.f32 0.5, %v2707_v47 }
0x19dd   :  { %3713 = vtanh.f32 %v2809_v21 }
0x19de   :  { %3715 = vtanh.f32 %v2708_v19 }
0x19e0   :  { %v3710_v5 = vpop.eup %3709 }
0x19e1   :  { %2819 = vrot.lane.b32.xlu1 %v3710_v5, %s3725_s8 }
0x19e6   :  { %v3712_v52 = vpop.eup %3711 }
0x19e7   :  { %2718 = vrot.lane.b32.xlu0 %v3712_v52, %s3725_s8  ;;  %v3714_v55 = vpop.eup %3713 }
0x19e8   :  { %v2811_v14 = vmul.f32 0.5, %v3714_v55  ;;  %v3716_v56 = vpop.eup %3715 }
0x19e9   :  { %v2710_v61 = vmul.f32 0.5, %v3716_v56 }
0x19ea   :  { %v2812_v57 = vadd.f32 0.5, %v2811_v14 }
0x19eb   :  { %v2711_v17 = vadd.f32 0.5, %v2710_v61 }
0x19ec   :  { %v2817_v1 = vmul.f32 %v2815_v30, %v2812_v57 }
0x19ed   :  { %v2716_v8 = vmul.f32 %v2714_v2, %v2711_v17 }
0x1a53   :  { %v2820_v58 = vpop.permute.xlu1 %2819 }
0x1a54   :  { %v2822_v60 = vmul.f32 %v2820_v58, %v2812_v57 }
0x1a56   :  { %2824 = vrot.lane.b32.xlu1 %v2822_v60, %s3726_s9 }
0x1a59   :  { %v2719_v3 = vpop.permute.xlu0 %2718 }
0x1a5a   :  { %v2721_v62 = vmul.f32 %v2719_v3, %v2711_v17 }
0x1a5c   :  { %2723 = vrot.lane.b32.xlu0 %v2721_v62, %s3726_s9 }
0x1ac8   :  { %v2825_v4 = vpop.permute.xlu1 %2824 }
0x1ac9   :  { %v2827_v22 = vadd.f32 %v2825_v4, %v2817_v1 }
0x1acb   :  { %3717 = vtanh.f32 %v2827_v22 }
0x1ace   :  { %v2724_v7 = vpop.permute.xlu0 %2723 }
0x1acf   :  { %v2726_v9 = vadd.f32 %v2724_v7, %v2716_v8 }
0x1ad1   :  { %3719 = vtanh.f32 %v2726_v9 }
0x1ad5   :  { %v3718_v15 = vpop.eup %3717 }
0x1ad6   :  { %2830 = vrot.lane.b32.xlu1 %v3718_v15, %s3726_s9 }
0x1ada   :  { %2393 = vrot.lane.b32.xlu1 %v4260_v53, %s3727_s10  ;;  %v2851_v53 = vld [vmem:[%s4376_s1 + $0x118] sm:$0xff] }
0x1adb   :  { %v3720_v6 = vpop.eup %3719 }
0x1adc   :  { %2729 = vrot.lane.b32.xlu0 %v3720_v6, %s3726_s9 }
0x1ade   :  { %2123 = vrot.lane.b32.xlu1 %v4216_v35, %s3727_s10  ;;  %v2852_v35 = vld [vmem:[%s4376_s1 + $0x120] sm:$0xff] }
0x1adf   :  { %v3556_v10 = vpack.c.bf16 %v2852_v35, %v2851_v53 }
0x1ae0   :  { %2625 = vrot.lane.b32.xlu0 %v2618_v38, %s3727_s10 }
0x1ae1   :  { %3557 = vmatprep.subr.bf16.mxu0 %v3556_v10 }
0x1ae2   :  { %3559 = vmatpush3.bf16.msra.mxu0 %v3556_v10 }
0x1ae4   :  { %1908 = vrot.lane.b32.xlu0 %v4175_v37, %s3727_s10  ;;  %v2853_v37 = vld [vmem:[%s4376_s1 + $0x128] sm:$0xf] }
0x1ae5   :  { %3454 = vmatprep.subr.msk.mxu0 %vm201_vm5, %v2853_v37 }
0x1ae6   :  { %3455 = vmatpush3.msk.msra.mxu0 %vm201_vm5, %v2853_v37 }
0x1ae7   :  { %3561 = vmatprep.subr.bf16.mxu0 %v3560_v20 }
0x1ae8   :  { %2395 = vrot.lane.b32.xlu0 %v4262_v12, %s3727_s10 }
0x1aec   :  { %2383 = vrot.lane.b32.xlu0 %v4266_v54, %s3727_s10 }
0x1af0   :  { %2620 = vrot.lane.b32.xlu0 %v2509_v42, %s3727_s10 }
0x1b48   :  { %v2831_v12 = vpop.permute.xlu1 %2830 }
0x1b49   :  { %v2833_v54 = vmul.f32 %v2831_v12, %v2812_v57 }
0x1b4b   :  { %2840 = vrot.lane.b32.xlu1 %v2833_v54, %s3727_s10 }
0x1b4c   :  { %v2394_v18 = vpop.permute.xlu1 %2393 }
0x1b4d   :  { %2399 = vst.msk [vmem:[#allocation5] sm:$0xc0] %vm888_vm10, %v2394_v18 }
0x1b4e   :  { %v2730_v23 = vpop.permute.xlu0 %2729 }
0x1b4f   :  { %2118 = vrot.lane.b32.xlu1 %v4212_v32, %s3727_s10  ;;  %v2732_v26 = vmul.f32 %v2730_v23, %v2711_v17 }
0x1b50   :  { %v2124_v11 = vpop.permute.xlu1 %2123 }
0x1b51   :  { %2126 = vst.msk [vmem:[#allocation5 + $0x8] sm:$0xe] %vm624_vm11, %v2124_v11 }
0x1b52   :  { %v2626_v24 = vpop.permute.xlu0 %2625 }
0x1b53   :  { %2628 = vst.msk [vmem:[#allocation5] sm:$0x38] %vm618_vm12, %v2626_v24  ;;  %2385 = vrot.lane.b32.xlu1 %v4268_v40, %s3727_s10 }
0x1b56   :  { %v1909_v16 = vpop.permute.xlu0 %1908 }
0x1b57   :  { %1911 = vst.msk [vmem:[#allocation5 + $0x8] sm:$0x70] %vm407_vm13, %v1909_v16  ;;  %2835 = vrot.lane.b32.xlu1 %v2732_v26, %s3727_s10 }
0x1b5a   :  { %v2396_v28 = vpop.permute.xlu0 %2395 }
0x1b5b   :  { %2400 = vst.msk [vmem:[#allocation5 + $0x8] sm:$0x1] %vm890_vm14, %v2396_v28 }
0x1b5e   :  { %v2384_v63 = vpop.permute.xlu0 %2383 }
0x1b5f   :  { %2389 = vst.msk [vmem:[#allocation4] sm:$0xc0] %vm888_vm10, %v2384_v63 }
0x1b62   :  { %v2621_v32 = vpop.permute.xlu0 %2620  ;;  %v2847_v31 = vld [vmem:[#allocation5 + $0x8] sm:$0x7f] }
0x1b63   :  { %2623 = vst.msk [vmem:[#allocation4 + $0x8] sm:$0xe] %vm624_vm11, %v2621_v32 }
0x1bbd   :  { %v2841_v44 = vpop.permute.xlu1 %2840 }
0x1bbe   :  { %2843 = vst.msk [vmem:[#allocation5] sm:$0x7] %vm401_vm7, %v2841_v44 }
0x1bc1   :  { %v2119_v29 = vpop.permute.xlu1 %2118 }
0x1bc2   :  { %2121 = vst.msk [vmem:[#allocation4] sm:$0x38] %vm618_vm12, %v2119_v29 }
0x1bc5   :  { %v2386_v40 = vpop.permute.xlu1 %2385  ;;  %v2846_v0 = vld [vmem:[#allocation5] sm:$0xff] }
0x1bc6   :  { %2390 = vst.msk [vmem:[#allocation4 + $0x8] sm:$0x1] %vm890_vm14, %v2386_v40  ;;  %3456 = vmatprep.mubr.msk.f32.mxu0 %vm197_vm6, %v2846_v0 }
0x1bc7   :  { %3457 = vmatmul.mubr.msk.f32.vlgmr.msra.gmra.mrb[22].mxu0 %vm197_vm6, %v2847_v31 }
0x1bc8   :  { %3563 = vmatpush3.bf16.msra.mxu0 %v3560_v20 }
0x1bc9   :  { %v2836_v34 = vpop.permute.xlu1 %2835  ;;  %v2844_v36 = vld [vmem:[#allocation4] sm:$0xff]  ;;  %3463 = vmatprep.subr.msk.mxu0 %vm201_vm5, %v2850_v33 }
0x1bca   :  { %2838 = vst.msk [vmem:[#allocation4 + $0x8] sm:$0x70] %vm407_vm13, %v2836_v34  ;;  %3465 = vmatprep.mubr.msk.f32.mxu0 %vm197_vm6, %v2844_v36 }
0x1bcc   :  { %3464 = vmatpush3.msk.msra.mxu0 %vm201_vm5, %v2850_v33 }
0x1bd1   :  { %v2845_v38 = vld [vmem:[#allocation4 + $0x8] sm:$0x7f] }
0x1bd2   :  { %3466 = vmatmul.mubr.msk.f32.vlgmr.msra.gmra.mrb[22].mxu0 %vm197_vm6, %v2845_v38 }
0x1ca5   :  { %v3467_v41 = vpop.f32.mrb[22].mxu0 }
0x1ca6   :  { %v3028_v42 = vadd.f32 %v3467_v41, %v3101_v39  ;;  %v3014_v59 = vpop.f32.mrb[23].mxu0 }
0x1ca7   :  { %v3027_v43 = vadd.f32 %v3101_v39, %v3014_v59 }
0x1ca8   :  { %3032 = vst.msk [vmem:[%s4378_s2 + $0x8] sm:$0x7f] %vm3031_vm15, %v3028_v42 }
0x1ca9   :  { %3030 = vst.msk [vmem:[%s4378_s2] sm:$0xff] %vm3029_vm0, %v3027_v43 }

</bundles_post_ra>
